<compile_context>
chip_gen: v7x
topology: tpu7x:2x2x1
jax: 0.10.0
libtpu: 0.0.40
codegen_flags: <defaults>
</compile_context>

<pallas_src>
import functools

import jax
import jax.numpy as jnp
from jax.experimental import pallas as pl
from jax.experimental.pallas import tpu as pltpu

_MiB = 1024 * 1024


def _round_up(x, m):
    return (x + m - 1) // m * m


def _pick_batch_block(B, T, target_rows=512):
    """Largest divisor of B giving ~target_rows rows (bb*T) per grid step."""
    bb = max(1, min(B, max(1, target_rows // max(T, 1))))
    while B % bb:
        bb -= 1
    # Megacore (v7x): prefer >= 2 grid steps when each step still keeps >=
    # target_rows rows for the MXU.
    if B // bb == 1 and B % 2 == 0 and (B // 2) * T >= target_rows:
        bb = B // 2
    return bb


def _vmem_limit(est_bytes, floor=32 * _MiB, cap=100 * _MiB):
    """Scoped-VMEM hint: estimated residency * 1.5, clamped to [32, 100] MiB."""
    return int(max(floor, min(cap, 1.5 * est_bytes)))


def _weight_spec(shape):
    """Constant-index (grid-invariant) block: single buffer, no double-buffering."""
    nd = len(shape)
    return pl.BlockSpec(shape, lambda i, _nd=nd: (0,) * _nd,
                        pipeline_mode=pl.Buffered(1))


# ----------------------------------------------------------------------------
# glue: sincos position embedding (matches posemb_sincos_2d)
# ----------------------------------------------------------------------------
def posemb_sincos_2d(h, w, dim, temperature=10000.0, dtype=jnp.float32):
    assert dim % 4 == 0, "feature dimension must be multiple of 4 for sincos emb"
    y, x = jnp.meshgrid(jnp.arange(h), jnp.arange(w), indexing="ij")
    omega = jnp.arange(dim // 4) / (dim // 4 - 1)
    omega = 1.0 / (temperature ** omega)
    y = y.flatten()[:, None] * omega[None, :]
    x = x.flatten()[:, None] * omega[None, :]
    pe = jnp.concatenate([jnp.sin(x), jnp.cos(x), jnp.sin(y), jnp.cos(y)], axis=1)
    return pe.astype(dtype)


# glue: strided-conv patch extraction (Conv2d kernel==stride==patch_size),
# zero-padded on the patch dim to `p_pad` for a lane-aligned contraction;
# returned in bf16 so the kernel DMA is half-width.
def extract_patches(img, p, p_pad):
    B, Cin, H, W = img.shape
    hh, ww = H // p, W // p
    x = img.reshape(B, Cin, hh, p, ww, p)
    x = x.transpose(0, 2, 4, 1, 3, 5)              # (B, hh, ww, Cin, p, p)
    x = x.reshape(B, hh * ww, Cin * p * p)         # (B, T, P)
    P = Cin * p * p
    if p_pad > P:
        x = jnp.pad(x, ((0, 0), (0, 0), (0, p_pad - P)))
    return x.astype(jnp.bfloat16)                  # (B, T, Ppad) bf16


# ----------------------------------------------------------------------------
# kernel 1: patch embedding  (patches @ W + b + pos_emb)
# ----------------------------------------------------------------------------
def _patch_embed_kernel(p_ref, w_ref, b_ref, pe_ref, o_ref):
    Bb, T, Pp = p_ref.shape
    C = w_ref.shape[1]
    x = p_ref[...].reshape(Bb * T, Pp)                                # bf16
    y = jnp.dot(x, w_ref[...], preferred_element_type=jnp.float32)   # (Bb*T, C)
    y = y + b_ref[...]                                                # (1, C)
    y = y.reshape(Bb, T, C) + pe_ref[...]                             # (T, C)
    o_ref[...] = y.astype(o_ref.dtype)


def patch_embed(patches, w, b, pe, bb):
    B, T, Pp = patches.shape
    C = w.shape[1]
    rows = bb * T
    est = 2 * Pp * C + 4 * (T + 1) * C + 2 * 2 * rows * (Pp + C) + 4 * rows * C
    return pl.pallas_call(
        _patch_embed_kernel,
        out_shape=jax.ShapeDtypeStruct((B, T, C), jnp.bfloat16),
        grid=(B // bb,),
        in_specs=[
            pl.BlockSpec((bb, T, Pp), lambda i: (i, 0, 0)),
            _weight_spec((Pp, C)),
            _weight_spec((1, C)),
            _weight_spec((T, C)),
        ],
        out_specs=pl.BlockSpec((bb, T, C), lambda i: (i, 0, 0)),
        compiler_params=pltpu.CompilerParams(
            dimension_semantics=("parallel",),
            vmem_limit_bytes=_vmem_limit(est)),
    )(patches, w, b, pe)


# ----------------------------------------------------------------------------
# kernel 2: transformer block (RMSNorm -> attention -> RMSNorm -> gated MLP)
# ----------------------------------------------------------------------------
def _rmsnorm(x, w, eps=1e-6):
    norm = jnp.mean(x * x, axis=-1, keepdims=True)
    return x * jax.lax.rsqrt(norm + eps) * w


def _block_kernel(n_head, h_ref, wqkv_ref, wap_ref, wu_ref, wvg_ref, wmp_ref,
                  ga_ref, gm_ref, o_ref):
    Bb, T, C = h_ref.shape
    D = C // n_head

    h = h_ref[...].reshape(Bb * T, C).astype(jnp.float32)

    # --- attention half (reference: h = rmsnorm_att(h); ...; h = h + h_att) ---
    hn = _rmsnorm(h, ga_ref[...])
    hn_b = hn.astype(jnp.bfloat16)
    # One fused QKV matmul; the 1/sqrt(D) softmax scale is pre-folded into W_q.
    qkv = jnp.dot(hn_b, wqkv_ref[...], preferred_element_type=jnp.float32)
    q = qkv[:, :C].reshape(Bb, T, C).astype(jnp.bfloat16)
    k = qkv[:, C:2 * C].reshape(Bb, T, C).astype(jnp.bfloat16)
    v = qkv[:, 2 * C:].reshape(Bb, T, C).astype(jnp.bfloat16)

    # Per-head attention, batched over the Bb samples of this grid step.
    # Each head's output is immediately projected with the matching D-row slice
    # of W_att_proj and accumulated into the residual -- mathematically equal to
    # concat(heads) @ W_att_proj (no bias), so no VMEM scratch and no masked
    # non-128-aligned lane stores/concat are needed.
    # TODO(synk): fold the head loop into one (Bb*n_head)-batched einsum once
    # Mosaic supports the (b,t,h,d)->(b,h,t,d) relayout inside the kernel.
    h1 = hn                                        # residual on normed h (as in ref)
    for hd in range(n_head):
        lo, hi = hd * D, (hd + 1) * D
        qh, kh, vh = q[:, :, lo:hi], k[:, :, lo:hi], v[:, :, lo:hi]
        s = jnp.einsum("bqd,bkd->bqk", qh, kh,
                       preferred_element_type=jnp.float32)
        s = s - jnp.max(s, axis=-1, keepdims=True)
        p = jnp.exp(s)                             # f32 softmax
        p = p * pl.reciprocal(jnp.sum(p, axis=-1, keepdims=True), approx=True)
        oh = jnp.einsum("bqk,bkd->bqd", p.astype(jnp.bfloat16), vh,
                        preferred_element_type=jnp.float32)
        h1 = h1 + jnp.dot(oh.reshape(Bb * T, D).astype(jnp.bfloat16),
                          wap_ref[lo:hi, :], preferred_element_type=jnp.float32)

    # --- MLP half (reference: h = rmsnorm_mlp(h); ...; h = h + h_mlp) ---
    h1n = _rmsnorm(h1, gm_ref[...])
    h1n_b = h1n.astype(jnp.bfloat16)
    u = jnp.dot(h1n_b, wu_ref[...], preferred_element_type=jnp.float32)
    vg = jnp.dot(h1n_b, wvg_ref[...], preferred_element_type=jnp.float32)
    x_mlp = (u * (vg * jax.nn.sigmoid(vg))).astype(jnp.bfloat16)   # u * silu(v)
    h_mlp = jnp.dot(x_mlp, wmp_ref[...], preferred_element_type=jnp.float32)
    o_ref[...] = (h1n + h_mlp).reshape(Bb, T, C).astype(o_ref.dtype)


def transformer_block(h, blk_params, n_head, bb):
    B, T, C = h.shape
    wqkv, wap, wu, wvg, wmp, ga, gm = blk_params
    rows = bb * T
    est = (2 * 16 * C * C              # bf16 weights, single-buffered
           + 2 * 2 * 2 * rows * C      # bf16 h/o blocks, double-buffered
           + 4 * rows * 16 * C         # f32 qkv/u/vg/residual temporaries
           + 4 * bb * T * T * 2)       # f32 scores + probs (one head live)
    # TODO(synk): for C >= ~1024 on v7x (64 MiB VMEM) tile wu/wvg/wmp along the
    # 4C axis (inner "arbitrary" grid dim) or split attention/MLP into two calls.
    # TODO(synk): optional v6e variant: fuse the layer loop into one pallas_call
    # (grid=(B//bb, n_layer)) with a VMEM-resident residual stream.
    # TODO(synk): optional v7x variant: fp8 weights with per-tensor scales.
    kern = functools.partial(_block_kernel, n_head)
    return pl.pallas_call(
        kern,
        out_shape=jax.ShapeDtypeStruct((B, T, C), jnp.bfloat16),
        grid=(B // bb,),
        in_specs=[
            pl.BlockSpec((bb, T, C), lambda i: (i, 0, 0)),
            _weight_spec((C, 3 * C)),
            _weight_spec((C, C)),
            _weight_spec((C, 4 * C)),
            _weight_spec((C, 4 * C)),
            _weight_spec((4 * C, C)),
            _weight_spec((1, C)),
            _weight_spec((1, C)),
        ],
        out_specs=pl.BlockSpec((bb, T, C), lambda i: (i, 0, 0)),
        compiler_params=pltpu.CompilerParams(
            dimension_semantics=("parallel",),
            vmem_limit_bytes=_vmem_limit(est)),
    )(h, wqkv, wap, wu, wvg, wmp, ga, gm)


# ----------------------------------------------------------------------------
# kernel 3a: gridded mean-pool over tokens
# ----------------------------------------------------------------------------
def _pool_kernel(x_ref, o_ref):
    x = x_ref[...].astype(jnp.float32)                   # (Bb, T, C)
    o_ref[...] = jnp.mean(x, axis=1, keepdims=True)      # (Bb, 1, C)


def token_mean_pool(x, bb):
    B, T, C = x.shape
    est = 2 * 2 * bb * T * C * 2 + 4 * bb * C * 2
    return pl.pallas_call(
        _pool_kernel,
        out_shape=jax.ShapeDtypeStruct((B, 1, C), jnp.float32),
        grid=(B // bb,),
        in_specs=[pl.BlockSpec((bb, T, C), lambda i: (i, 0, 0))],
        out_specs=pl.BlockSpec((bb, 1, C), lambda i: (i, 0, 0)),
        compiler_params=pltpu.CompilerParams(
            dimension_semantics=("parallel",),
            vmem_limit_bytes=_vmem_limit(est)),
    )(x)


# ----------------------------------------------------------------------------
# kernel 3b: LayerNorm + classifier on the pooled (B, C) in a single step
# ----------------------------------------------------------------------------
def _head_kernel(m_ref, lnw_ref, lnb_ref, w_ref, b_ref, o_ref):
    m = m_ref[...].astype(jnp.float32)                    # (B, C)
    mu = jnp.mean(m, axis=-1, keepdims=True)
    var = jnp.mean((m - mu) * (m - mu), axis=-1, keepdims=True)
    xn = (m - mu) * jax.lax.rsqrt(var + 1e-5)
    xn = xn * lnw_ref[...] + lnb_ref[...]
    o_ref[...] = jnp.dot(xn.astype(jnp.bfloat16), w_ref[...],
                         preferred_element_type=jnp.float32) + b_ref[...]


def mlp_head(pooled, lnw, lnb, w, b):
    B, C = pooled.shape
    NP = w.shape[1]                                       # padded class count
    est = 2 * C * NP + 4 * (2 * B * C + 2 * B * NP + 2 * C + NP)
    # TODO(synk): for very large B grid this kernel over batch chunks as well.
    return pl.pallas_call(
        _head_kernel,
        out_shape=jax.ShapeDtypeStruct((B, NP), jnp.float32),
        grid=(1,),
        in_specs=[
            pl.BlockSpec((B, C), lambda i: (0, 0)),
            pl.BlockSpec((1, C), lambda i: (0, 0)),
            pl.BlockSpec((1, C), lambda i: (0, 0)),
            pl.BlockSpec((C, NP), lambda i: (0, 0)),
            pl.BlockSpec((1, NP), lambda i: (0, 0)),
        ],
        out_specs=pl.BlockSpec((B, NP), lambda i: (0, 0)),
        compiler_params=pltpu.CompilerParams(vmem_limit_bytes=_vmem_limit(est)),
    )(pooled, lnw, lnb, w, b)


# ----------------------------------------------------------------------------
# full ViT forward
# ----------------------------------------------------------------------------
def vit_forward(img, params, *, patch_size, n_head, num_classes):
    B = img.shape[0]
    p_pad = params["patch_w"].shape[0]
    patches = extract_patches(img, patch_size, p_pad)                # (B, T, Ppad)
    T = patches.shape[1]
    bb = _pick_batch_block(B, T)

    x = patch_embed(patches, params["patch_w"], params["patch_b"],
                    params["pos_emb"], bb)                           # (B, T, C) bf16
    # dropout(p=0.0) is the identity at inference; omitted.
    for blk in params["blocks"]:
        x = transformer_block(x, blk, n_head, bb)                    # (B, T, C) bf16
    pooled = token_mean_pool(x, bb).reshape(B, -1)                   # (B, C) f32
    logits_p = mlp_head(pooled, params["ln_w"], params["ln_b"],
                        params["head_w"], params["head_b"])          # (B, NP)
    return logits_p[:, :num_classes]                                 # (B, num_classes)


# ----------------------------------------------------------------------------
# deterministic parameter construction + demo
# ----------------------------------------------------------------------------
def make_params(key, *, channels, patch_size, image_size, n_embd, n_head,
                n_layer, num_classes):
    T_side = image_size // patch_size
    P = channels * patch_size * patch_size
    Pp = _round_up(P, 128)
    NP = _round_up(num_classes, 128)
    D = n_embd // n_head
    qk_scale = 1.0 / (D ** 0.5)                  # use_nViT == 0 softmax scale
    std = 0.02
    std_proj = 0.02 / (2 * n_layer) ** 0.5

    keys = jax.random.split(key, 2 + 7 * n_layer)
    ki = iter(keys)

    patch_w = jax.random.normal(next(ki), (P, n_embd), jnp.float32) * std
    patch_w = jnp.pad(patch_w, ((0, Pp - P), (0, 0))).astype(jnp.bfloat16)
    head_w = jax.random.normal(next(ki), (n_embd, num_classes), jnp.float32) * std
    head_w = jnp.pad(head_w, ((0, 0), (0, NP - num_classes))).astype(jnp.bfloat16)

    params = {
        "patch_w": patch_w,                                  # (Ppad, C) bf16
        "patch_b": jnp.zeros((1, n_embd), jnp.float32),
        "pos_emb": posemb_sincos_2d(T_side, T_side, n_embd),
        "ln_w": jnp.ones((1, n_embd), jnp.float32),
        "ln_b": jnp.zeros((1, n_embd), jnp.float32),
        "head_w": head_w,                                    # (C, NPad) bf16
        "head_b": jnp.zeros((1, NP), jnp.float32),
        "blocks": [],
    }
    for _ in range(n_layer):
        wq = jax.random.normal(next(ki), (n_embd, n_embd), jnp.float32) * std
        wk = jax.random.normal(next(ki), (n_embd, n_embd), jnp.float32) * std
        wv = jax.random.normal(next(ki), (n_embd, n_embd), jnp.float32) * std
        # Fused QKV weight; the 1/sqrt(D) attention scale is folded into W_q so
        # the kernel never multiplies the O(T^2) score tensor.
        wqkv = jnp.concatenate([wq * qk_scale, wk, wv], axis=1).astype(jnp.bfloat16)
        wap = (jax.random.normal(next(ki), (n_embd, n_embd), jnp.float32)
               * std_proj).astype(jnp.bfloat16)
        # c_fc (C -> 8C) split into the u-half and the v(gate)-half
        wu = (jax.random.normal(next(ki), (n_embd, 4 * n_embd), jnp.float32)
              * std).astype(jnp.bfloat16)
        wvg = (jax.random.normal(next(ki), (n_embd, 4 * n_embd), jnp.float32)
               * std).astype(jnp.bfloat16)
        wmp = (jax.random.normal(next(ki), (4 * n_embd, n_embd), jnp.float32)
               * std_proj).astype(jnp.bfloat16)
        ga = jnp.ones((1, n_embd), jnp.float32)
        gm = jnp.ones((1, n_embd), jnp.float32)
        params["blocks"].append((wqkv, wap, wu, wvg, wmp, ga, gm))
    return params


if __name__ == "__main__":
    # small config consistent with the module: image 16, patch 4 -> T = 16 tokens
    B, CHANNELS, IMAGE, PATCH = 2, 3, 16, 4
    N_EMBD, N_HEAD, N_LAYER, NUM_CLASSES = 32, 4, 2, 16

    key = jax.random.PRNGKey(0)
    k_img, k_par = jax.random.split(key)

    img = jax.random.normal(k_img, (B, CHANNELS, IMAGE, IMAGE), jnp.float32)  # NCHW
    params = make_params(k_par, channels=CHANNELS, patch_size=PATCH,
                         image_size=IMAGE, n_embd=N_EMBD, n_head=N_HEAD,
                         n_layer=N_LAYER, num_classes=NUM_CLASSES)

    fwd = jax.jit(functools.partial(vit_forward, patch_size=PATCH,
                                    n_head=N_HEAD, num_classes=NUM_CLASSES))
    logits = fwd(img, params)
    jax.block_until_ready(logits)
    assert logits.shape == (B, NUM_CLASSES)
    assert bool(jnp.isfinite(logits).all())
    print("KERNEL_OK")
</pallas_src>

<mosaic_0001>
module attributes {stable_mosaic.version = 11 : i64} {
  func.func @_block_kernel(%arg0: i32, %arg1: memref<2x16x32xbf16, #tpu.memory_space<vmem>>, %arg2: memref<32x96xbf16, #tpu.memory_space<vmem>>, %arg3: memref<32x32xbf16, #tpu.memory_space<vmem>>, %arg4: memref<32x128xbf16, #tpu.memory_space<vmem>>, %arg5: memref<32x128xbf16, #tpu.memory_space<vmem>>, %arg6: memref<128x32xbf16, #tpu.memory_space<vmem>>, %arg7: memref<1x32xf32, #tpu.memory_space<vmem>>, %arg8: memref<1x32xf32, #tpu.memory_space<vmem>>, %arg9: memref<2x16x32xbf16, #tpu.memory_space<vmem>>) attributes {dimension_semantics = [#tpu.dimension_semantics<parallel>], iteration_bounds = array<i64: 1>, scalar_prefetch = 0 : i64, scratch_operands = 0 : i64, tpu.core_type = #tpu.core_type<tc>, window_params = [{transform_indices = @transform_0, window_bounds = array<i64: 2, 16, 32>}, {pipeline_mode = #tpu.pipeline_mode<synchronous>, transform_indices = @transform_1, window_bounds = array<i64: 32, 96>}, {pipeline_mode = #tpu.pipeline_mode<synchronous>, transform_indices = @transform_2, window_bounds = array<i64: 32, 32>}, {pipeline_mode = #tpu.pipeline_mode<synchronous>, transform_indices = @transform_3, window_bounds = array<i64: 32, 128>}, {pipeline_mode = #tpu.pipeline_mode<synchronous>, transform_indices = @transform_4, window_bounds = array<i64: 32, 128>}, {pipeline_mode = #tpu.pipeline_mode<synchronous>, transform_indices = @transform_5, window_bounds = array<i64: 128, 32>}, {pipeline_mode = #tpu.pipeline_mode<synchronous>, transform_indices = @transform_6, window_bounds = array<i64: 1, 32>}, {pipeline_mode = #tpu.pipeline_mode<synchronous>, transform_indices = @transform_7, window_bounds = array<i64: 1, 32>}, {transform_indices = @transform_8, window_bounds = array<i64: 2, 16, 32>}]} {
    %c0 = arith.constant 0 : index
    %c0_0 = arith.constant 0 : index
    %c0_1 = arith.constant 0 : index
    %0 = vector.load %arg1[%c0, %c0_0, %c0_1] : memref<2x16x32xbf16, #tpu.memory_space<vmem>>, vector<2x16x32xbf16>
    %1 = vector.shape_cast %0 : vector<2x16x32xbf16> to vector<32x32xbf16>
    %2 = arith.extf %1 : vector<32x32xbf16> to vector<32x32xf32>
    %c0_2 = arith.constant 0 : index
    %c0_3 = arith.constant 0 : index
    %3 = vector.load %arg7[%c0_2, %c0_3] : memref<1x32xf32, #tpu.memory_space<vmem>>, vector<1x32xf32>
    %4 = arith.mulf %2, %2 : vector<32x32xf32>
    %cst = arith.constant dense<0.000000e+00> : vector<32xf32>
    %5 = vector.multi_reduction <add>, %4, %cst [1] : vector<32x32xf32> to vector<32xf32>
    %6 = vector.shape_cast %5 : vector<32xf32> to vector<32x1xf32>
    %cst_4 = arith.constant 3.200000e+01 : f32
    %7 = vector.broadcast %cst_4 : f32 to vector<32x1xf32>
    %8 = arith.divf %6, %7 : vector<32x1xf32>
    %cst_5 = arith.constant 9.99999997E-7 : f32
    %9 = vector.broadcast %cst_5 : f32 to vector<32x1xf32>
    %10 = arith.addf %8, %9 : vector<32x1xf32>
    %11 = math.rsqrt %10 : vector<32x1xf32>
    %12 = vector.broadcast %11 : vector<32x1xf32> to vector<32x32xf32>
    %13 = arith.mulf %2, %12 : vector<32x32xf32>
    %14 = vector.broadcast %3 : vector<1x32xf32> to vector<32x32xf32>
    %15 = arith.mulf %13, %14 : vector<32x32xf32>
    %16 = arith.truncf %15 : vector<32x32xf32> to vector<32x32xbf16>
    %c0_6 = arith.constant 0 : index
    %c0_7 = arith.constant 0 : index
    %17 = vector.load %arg2[%c0_6, %c0_7] : memref<32x96xbf16, #tpu.memory_space<vmem>>, vector<32x96xbf16>
    %cst_8 = arith.constant dense<0.000000e+00> : vector<32x96xf32>
    %18 = tpu.matmul %16, %17, %cst_8 {dimension_numbers = #tpu.dot_dimension_numbers<[1], [0], [0], [1], [0, 0, 1, 1], [], []>} : vector<32x32xbf16>, vector<32x96xbf16>, vector<32x96xf32> -> vector<32x96xf32>
    %19 = vector.extract_strided_slice %18 {offsets = [0, 0], sizes = [32, 32], strides = [1, 1]} : vector<32x96xf32> to vector<32x32xf32>
    %20 = vector.shape_cast %19 : vector<32x32xf32> to vector<2x16x32xf32>
    %21 = arith.truncf %20 : vector<2x16x32xf32> to vector<2x16x32xbf16>
    %22 = vector.extract_strided_slice %18 {offsets = [0, 32], sizes = [32, 32], strides = [1, 1]} : vector<32x96xf32> to vector<32x32xf32>
    %23 = vector.shape_cast %22 : vector<32x32xf32> to vector<2x16x32xf32>
    %24 = arith.truncf %23 : vector<2x16x32xf32> to vector<2x16x32xbf16>
    %25 = vector.extract_strided_slice %18 {offsets = [0, 64], sizes = [32, 32], strides = [1, 1]} : vector<32x96xf32> to vector<32x32xf32>
    %26 = vector.shape_cast %25 : vector<32x32xf32> to vector<2x16x32xf32>
    %27 = arith.truncf %26 : vector<2x16x32xf32> to vector<2x16x32xbf16>
    %28 = vector.extract_strided_slice %21 {offsets = [0, 0, 0], sizes = [2, 16, 8], strides = [1, 1, 1]} : vector<2x16x32xbf16> to vector<2x16x8xbf16>
    %29 = vector.extract_strided_slice %24 {offsets = [0, 0, 0], sizes = [2, 16, 8], strides = [1, 1, 1]} : vector<2x16x32xbf16> to vector<2x16x8xbf16>
    %30 = vector.extract_strided_slice %27 {offsets = [0, 0, 0], sizes = [2, 16, 8], strides = [1, 1, 1]} : vector<2x16x32xbf16> to vector<2x16x8xbf16>
    "tpu.trace_start"() <{level = 10 : i32, message = "bqd,bkd->bqk"}> : () -> ()
    %cst_9 = arith.constant dense<0.000000e+00> : vector<2x16x16xf32>
    %31 = tpu.matmul %28, %29, %cst_9 {dimension_numbers = #tpu.dot_dimension_numbers<[2], [2], [1], [1], [0, 0, 0, 1, 1, 1], [0], [0]>} : vector<2x16x8xbf16>, vector<2x16x8xbf16>, vector<2x16x16xf32> -> vector<2x16x16xf32>
    "tpu.trace_stop"() : () -> ()
    %cst_10 = arith.constant dense<0xFF800000> : vector<2x16xf32>
    %32 = vector.multi_reduction <maximumf>, %31, %cst_10 [2] : vector<2x16x16xf32> to vector<2x16xf32>
    %33 = vector.shape_cast %32 : vector<2x16xf32> to vector<2x16x1xf32>
    %34 = vector.broadcast %33 : vector<2x16x1xf32> to vector<2x16x16xf32>
    %35 = arith.subf %31, %34 : vector<2x16x16xf32>
    %36 = math.exp %35 : vector<2x16x16xf32>
    %cst_11 = arith.constant dense<0.000000e+00> : vector<2x16xf32>
    %37 = vector.multi_reduction <add>, %36, %cst_11 [2] : vector<2x16x16xf32> to vector<2x16xf32>
    %38 = vector.shape_cast %37 : vector<2x16xf32> to vector<2x16x1xf32>
    %39 = tpu.reciprocal %38 {approx = true} : vector<2x16x1xf32> -> vector<2x16x1xf32>
    %40 = vector.broadcast %39 : vector<2x16x1xf32> to vector<2x16x16xf32>
    %41 = arith.mulf %36, %40 : vector<2x16x16xf32>
    %42 = arith.truncf %41 : vector<2x16x16xf32> to vector<2x16x16xbf16>
    "tpu.trace_start"() <{level = 10 : i32, message = "bqk,bkd->bqd"}> : () -> ()
    %cst_12 = arith.constant dense<0.000000e+00> : vector<2x16x8xf32>
    %43 = tpu.matmul %42, %30, %cst_12 {dimension_numbers = #tpu.dot_dimension_numbers<[2], [1], [1], [2], [0, 0, 0, 1, 1, 2], [0], [0]>} : vector<2x16x16xbf16>, vector<2x16x8xbf16>, vector<2x16x8xf32> -> vector<2x16x8xf32>
    "tpu.trace_stop"() : () -> ()
    %44 = vector.shape_cast %43 : vector<2x16x8xf32> to vector<32x8xf32>
    %45 = arith.truncf %44 : vector<32x8xf32> to vector<32x8xbf16>
    %c0_13 = arith.constant 0 : index
    %c0_14 = arith.constant 0 : index
    %46 = vector.load %arg3[%c0_13, %c0_14] : memref<32x32xbf16, #tpu.memory_space<vmem>>, vector<8x32xbf16>
    %cst_15 = arith.constant dense<0.000000e+00> : vector<32x32xf32>
    %47 = tpu.matmul %45, %46, %cst_15 {dimension_numbers = #tpu.dot_dimension_numbers<[1], [0], [0], [1], [0, 0, 1, 1], [], []>} : vector<32x8xbf16>, vector<8x32xbf16>, vector<32x32xf32> -> vector<32x32xf32>
    %48 = arith.addf %15, %47 : vector<32x32xf32>
    %49 = vector.extract_strided_slice %21 {offsets = [0, 0, 8], sizes = [2, 16, 8], strides = [1, 1, 1]} : vector<2x16x32xbf16> to vector<2x16x8xbf16>
    %50 = vector.extract_strided_slice %24 {offsets = [0, 0, 8], sizes = [2, 16, 8], strides = [1, 1, 1]} : vector<2x16x32xbf16> to vector<2x16x8xbf16>
    %51 = vector.extract_strided_slice %27 {offsets = [0, 0, 8], sizes = [2, 16, 8], strides = [1, 1, 1]} : vector<2x16x32xbf16> to vector<2x16x8xbf16>
    "tpu.trace_start"() <{level = 10 : i32, message = "bqd,bkd->bqk"}> : () -> ()
    %cst_16 = arith.constant dense<0.000000e+00> : vector<2x16x16xf32>
    %52 = tpu.matmul %49, %50, %cst_16 {dimension_numbers = #tpu.dot_dimension_numbers<[2], [2], [1], [1], [0, 0, 0, 1, 1, 1], [0], [0]>} : vector<2x16x8xbf16>, vector<2x16x8xbf16>, vector<2x16x16xf32> -> vector<2x16x16xf32>
    "tpu.trace_stop"() : () -> ()
    %cst_17 = arith.constant dense<0xFF800000> : vector<2x16xf32>
    %53 = vector.multi_reduction <maximumf>, %52, %cst_17 [2] : vector<2x16x16xf32> to vector<2x16xf32>
    %54 = vector.shape_cast %53 : vector<2x16xf32> to vector<2x16x1xf32>
    %55 = vector.broadcast %54 : vector<2x16x1xf32> to vector<2x16x16xf32>
    %56 = arith.subf %52, %55 : vector<2x16x16xf32>
    %57 = math.exp %56 : vector<2x16x16xf32>
    %cst_18 = arith.constant dense<0.000000e+00> : vector<2x16xf32>
    %58 = vector.multi_reduction <add>, %57, %cst_18 [2] : vector<2x16x16xf32> to vector<2x16xf32>
    %59 = vector.shape_cast %58 : vector<2x16xf32> to vector<2x16x1xf32>
    %60 = tpu.reciprocal %59 {approx = true} : vector<2x16x1xf32> -> vector<2x16x1xf32>
    %61 = vector.broadcast %60 : vector<2x16x1xf32> to vector<2x16x16xf32>
    %62 = arith.mulf %57, %61 : vector<2x16x16xf32>
    %63 = arith.truncf %62 : vector<2x16x16xf32> to vector<2x16x16xbf16>
    "tpu.trace_start"() <{level = 10 : i32, message = "bqk,bkd->bqd"}> : () -> ()
    %cst_19 = arith.constant dense<0.000000e+00> : vector<2x16x8xf32>
    %64 = tpu.matmul %63, %51, %cst_19 {dimension_numbers = #tpu.dot_dimension_numbers<[2], [1], [1], [2], [0, 0, 0, 1, 1, 2], [0], [0]>} : vector<2x16x16xbf16>, vector<2x16x8xbf16>, vector<2x16x8xf32> -> vector<2x16x8xf32>
    "tpu.trace_stop"() : () -> ()
    %65 = vector.shape_cast %64 : vector<2x16x8xf32> to vector<32x8xf32>
    %66 = arith.truncf %65 : vector<32x8xf32> to vector<32x8xbf16>
    %c8 = arith.constant 8 : index
    %c0_20 = arith.constant 0 : index
    %67 = vector.load %arg3[%c8, %c0_20] : memref<32x32xbf16, #tpu.memory_space<vmem>>, vector<8x32xbf16>
    %cst_21 = arith.constant dense<0.000000e+00> : vector<32x32xf32>
    %68 = tpu.matmul %66, %67, %cst_21 {dimension_numbers = #tpu.dot_dimension_numbers<[1], [0], [0], [1], [0, 0, 1, 1], [], []>} : vector<32x8xbf16>, vector<8x32xbf16>, vector<32x32xf32> -> vector<32x32xf32>
    %69 = arith.addf %48, %68 : vector<32x32xf32>
    %70 = vector.extract_strided_slice %21 {offsets = [0, 0, 16], sizes = [2, 16, 8], strides = [1, 1, 1]} : vector<2x16x32xbf16> to vector<2x16x8xbf16>
    %71 = vector.extract_strided_slice %24 {offsets = [0, 0, 16], sizes = [2, 16, 8], strides = [1, 1, 1]} : vector<2x16x32xbf16> to vector<2x16x8xbf16>
    %72 = vector.extract_strided_slice %27 {offsets = [0, 0, 16], sizes = [2, 16, 8], strides = [1, 1, 1]} : vector<2x16x32xbf16> to vector<2x16x8xbf16>
    "tpu.trace_start"() <{level = 10 : i32, message = "bqd,bkd->bqk"}> : () -> ()
    %cst_22 = arith.constant dense<0.000000e+00> : vector<2x16x16xf32>
    %73 = tpu.matmul %70, %71, %cst_22 {dimension_numbers = #tpu.dot_dimension_numbers<[2], [2], [1], [1], [0, 0, 0, 1, 1, 1], [0], [0]>} : vector<2x16x8xbf16>, vector<2x16x8xbf16>, vector<2x16x16xf32> -> vector<2x16x16xf32>
    "tpu.trace_stop"() : () -> ()
    %cst_23 = arith.constant dense<0xFF800000> : vector<2x16xf32>
    %74 = vector.multi_reduction <maximumf>, %73, %cst_23 [2] : vector<2x16x16xf32> to vector<2x16xf32>
    %75 = vector.shape_cast %74 : vector<2x16xf32> to vector<2x16x1xf32>
    %76 = vector.broadcast %75 : vector<2x16x1xf32> to vector<2x16x16xf32>
    %77 = arith.subf %73, %76 : vector<2x16x16xf32>
    %78 = math.exp %77 : vector<2x16x16xf32>
    %cst_24 = arith.constant dense<0.000000e+00> : vector<2x16xf32>
    %79 = vector.multi_reduction <add>, %78, %cst_24 [2] : vector<2x16x16xf32> to vector<2x16xf32>
    %80 = vector.shape_cast %79 : vector<2x16xf32> to vector<2x16x1xf32>
    %81 = tpu.reciprocal %80 {approx = true} : vector<2x16x1xf32> -> vector<2x16x1xf32>
    %82 = vector.broadcast %81 : vector<2x16x1xf32> to vector<2x16x16xf32>
    %83 = arith.mulf %78, %82 : vector<2x16x16xf32>
    %84 = arith.truncf %83 : vector<2x16x16xf32> to vector<2x16x16xbf16>
    "tpu.trace_start"() <{level = 10 : i32, message = "bqk,bkd->bqd"}> : () -> ()
    %cst_25 = arith.constant dense<0.000000e+00> : vector<2x16x8xf32>
    %85 = tpu.matmul %84, %72, %cst_25 {dimension_numbers = #tpu.dot_dimension_numbers<[2], [1], [1], [2], [0, 0, 0, 1, 1, 2], [0], [0]>} : vector<2x16x16xbf16>, vector<2x16x8xbf16>, vector<2x16x8xf32> -> vector<2x16x8xf32>
    "tpu.trace_stop"() : () -> ()
    %86 = vector.shape_cast %85 : vector<2x16x8xf32> to vector<32x8xf32>
    %87 = arith.truncf %86 : vector<32x8xf32> to vector<32x8xbf16>
    %c16 = arith.constant 16 : index
    %c0_26 = arith.constant 0 : index
    %88 = vector.load %arg3[%c16, %c0_26] : memref<32x32xbf16, #tpu.memory_space<vmem>>, vector<8x32xbf16>
    %cst_27 = arith.constant dense<0.000000e+00> : vector<32x32xf32>
    %89 = tpu.matmul %87, %88, %cst_27 {dimension_numbers = #tpu.dot_dimension_numbers<[1], [0], [0], [1], [0, 0, 1, 1], [], []>} : vector<32x8xbf16>, vector<8x32xbf16>, vector<32x32xf32> -> vector<32x32xf32>
    %90 = arith.addf %69, %89 : vector<32x32xf32>
    %91 = vector.extract_strided_slice %21 {offsets = [0, 0, 24], sizes = [2, 16, 8], strides = [1, 1, 1]} : vector<2x16x32xbf16> to vector<2x16x8xbf16>
    %92 = vector.extract_strided_slice %24 {offsets = [0, 0, 24], sizes = [2, 16, 8], strides = [1, 1, 1]} : vector<2x16x32xbf16> to vector<2x16x8xbf16>
    %93 = vector.extract_strided_slice %27 {offsets = [0, 0, 24], sizes = [2, 16, 8], strides = [1, 1, 1]} : vector<2x16x32xbf16> to vector<2x16x8xbf16>
    "tpu.trace_start"() <{level = 10 : i32, message = "bqd,bkd->bqk"}> : () -> ()
    %cst_28 = arith.constant dense<0.000000e+00> : vector<2x16x16xf32>
    %94 = tpu.matmul %91, %92, %cst_28 {dimension_numbers = #tpu.dot_dimension_numbers<[2], [2], [1], [1], [0, 0, 0, 1, 1, 1], [0], [0]>} : vector<2x16x8xbf16>, vector<2x16x8xbf16>, vector<2x16x16xf32> -> vector<2x16x16xf32>
    "tpu.trace_stop"() : () -> ()
    %cst_29 = arith.constant dense<0xFF800000> : vector<2x16xf32>
    %95 = vector.multi_reduction <maximumf>, %94, %cst_29 [2] : vector<2x16x16xf32> to vector<2x16xf32>
    %96 = vector.shape_cast %95 : vector<2x16xf32> to vector<2x16x1xf32>
    %97 = vector.broadcast %96 : vector<2x16x1xf32> to vector<2x16x16xf32>
    %98 = arith.subf %94, %97 : vector<2x16x16xf32>
    %99 = math.exp %98 : vector<2x16x16xf32>
    %cst_30 = arith.constant dense<0.000000e+00> : vector<2x16xf32>
    %100 = vector.multi_reduction <add>, %99, %cst_30 [2] : vector<2x16x16xf32> to vector<2x16xf32>
    %101 = vector.shape_cast %100 : vector<2x16xf32> to vector<2x16x1xf32>
    %102 = tpu.reciprocal %101 {approx = true} : vector<2x16x1xf32> -> vector<2x16x1xf32>
    %103 = vector.broadcast %102 : vector<2x16x1xf32> to vector<2x16x16xf32>
    %104 = arith.mulf %99, %103 : vector<2x16x16xf32>
    %105 = arith.truncf %104 : vector<2x16x16xf32> to vector<2x16x16xbf16>
    "tpu.trace_start"() <{level = 10 : i32, message = "bqk,bkd->bqd"}> : () -> ()
    %cst_31 = arith.constant dense<0.000000e+00> : vector<2x16x8xf32>
    %106 = tpu.matmul %105, %93, %cst_31 {dimension_numbers = #tpu.dot_dimension_numbers<[2], [1], [1], [2], [0, 0, 0, 1, 1, 2], [0], [0]>} : vector<2x16x16xbf16>, vector<2x16x8xbf16>, vector<2x16x8xf32> -> vector<2x16x8xf32>
    "tpu.trace_stop"() : () -> ()
    %107 = vector.shape_cast %106 : vector<2x16x8xf32> to vector<32x8xf32>
    %108 = arith.truncf %107 : vector<32x8xf32> to vector<32x8xbf16>
    %c24 = arith.constant 24 : index
    %c0_32 = arith.constant 0 : index
    %109 = vector.load %arg3[%c24, %c0_32] : memref<32x32xbf16, #tpu.memory_space<vmem>>, vector<8x32xbf16>
    %cst_33 = arith.constant dense<0.000000e+00> : vector<32x32xf32>
    %110 = tpu.matmul %108, %109, %cst_33 {dimension_numbers = #tpu.dot_dimension_numbers<[1], [0], [0], [1], [0, 0, 1, 1], [], []>} : vector<32x8xbf16>, vector<8x32xbf16>, vector<32x32xf32> -> vector<32x32xf32>
    %111 = arith.addf %90, %110 : vector<32x32xf32>
    %c0_34 = arith.constant 0 : index
    %c0_35 = arith.constant 0 : index
    %112 = vector.load %arg8[%c0_34, %c0_35] : memref<1x32xf32, #tpu.memory_space<vmem>>, vector<1x32xf32>
    %113 = arith.mulf %111, %111 : vector<32x32xf32>
    %cst_36 = arith.constant dense<0.000000e+00> : vector<32xf32>
    %114 = vector.multi_reduction <add>, %113, %cst_36 [1] : vector<32x32xf32> to vector<32xf32>
    %115 = vector.shape_cast %114 : vector<32xf32> to vector<32x1xf32>
    %cst_37 = arith.constant 3.200000e+01 : f32
    %116 = vector.broadcast %cst_37 : f32 to vector<32x1xf32>
    %117 = arith.divf %115, %116 : vector<32x1xf32>
    %cst_38 = arith.constant 9.99999997E-7 : f32
    %118 = vector.broadcast %cst_38 : f32 to vector<32x1xf32>
    %119 = arith.addf %117, %118 : vector<32x1xf32>
    %120 = math.rsqrt %119 : vector<32x1xf32>
    %121 = vector.broadcast %120 : vector<32x1xf32> to vector<32x32xf32>
    %122 = arith.mulf %111, %121 : vector<32x32xf32>
    %123 = vector.broadcast %112 : vector<1x32xf32> to vector<32x32xf32>
    %124 = arith.mulf %122, %123 : vector<32x32xf32>
    %125 = arith.truncf %124 : vector<32x32xf32> to vector<32x32xbf16>
    %c0_39 = arith.constant 0 : index
    %c0_40 = arith.constant 0 : index
    %126 = vector.load %arg4[%c0_39, %c0_40] : memref<32x128xbf16, #tpu.memory_space<vmem>>, vector<32x128xbf16>
    %cst_41 = arith.constant dense<0.000000e+00> : vector<32x128xf32>
    %127 = tpu.matmul %125, %126, %cst_41 {dimension_numbers = #tpu.dot_dimension_numbers<[1], [0], [0], [1], [0, 0, 1, 1], [], []>} : vector<32x32xbf16>, vector<32x128xbf16>, vector<32x128xf32> -> vector<32x128xf32>
    %c0_42 = arith.constant 0 : index
    %c0_43 = arith.constant 0 : index
    %128 = vector.load %arg5[%c0_42, %c0_43] : memref<32x128xbf16, #tpu.memory_space<vmem>>, vector<32x128xbf16>
    %cst_44 = arith.constant dense<0.000000e+00> : vector<32x128xf32>
    %129 = tpu.matmul %125, %128, %cst_44 {dimension_numbers = #tpu.dot_dimension_numbers<[1], [0], [0], [1], [0, 0, 1, 1], [], []>} : vector<32x32xbf16>, vector<32x128xbf16>, vector<32x128xf32> -> vector<32x128xf32>
    %130 = arith.negf %129 : vector<32x128xf32>
    %131 = math.exp %130 : vector<32x128xf32>
    %cst_45 = arith.constant 1.000000e+00 : f32
    %132 = vector.broadcast %cst_45 : f32 to vector<32x128xf32>
    %133 = arith.addf %132, %131 : vector<32x128xf32>
    %134 = arith.divf %132, %133 : vector<32x128xf32>
    %135 = arith.mulf %129, %134 : vector<32x128xf32>
    %136 = arith.mulf %127, %135 : vector<32x128xf32>
    %137 = arith.truncf %136 : vector<32x128xf32> to vector<32x128xbf16>
    %c0_46 = arith.constant 0 : index
    %c0_47 = arith.constant 0 : index
    %138 = vector.load %arg6[%c0_46, %c0_47] : memref<128x32xbf16, #tpu.memory_space<vmem>>, vector<128x32xbf16>
    %cst_48 = arith.constant dense<0.000000e+00> : vector<32x32xf32>
    %139 = tpu.matmul %137, %138, %cst_48 {dimension_numbers = #tpu.dot_dimension_numbers<[1], [0], [0], [1], [0, 0, 1, 1], [], []>} : vector<32x128xbf16>, vector<128x32xbf16>, vector<32x32xf32> -> vector<32x32xf32>
    %140 = arith.addf %124, %139 : vector<32x32xf32>
    %141 = vector.shape_cast %140 : vector<32x32xf32> to vector<2x16x32xf32>
    %142 = arith.truncf %141 : vector<2x16x32xf32> to vector<2x16x32xbf16>
    %c0_49 = arith.constant 0 : index
    %c0_50 = arith.constant 0 : index
    %c0_51 = arith.constant 0 : index
    %143 = vector.load %arg9[%c0_49, %c0_50, %c0_51] : memref<2x16x32xbf16, #tpu.memory_space<vmem>>, vector<2x16x32xbf16>
    tpu.vector_store %arg9[%c0_49, %c0_50, %c0_51], %142 {strides = array<i32>} : memref<2x16x32xbf16, #tpu.memory_space<vmem>>, vector<2x16x32xbf16>,
    return
  }
  func.func @transform_0(%arg0: i32) -> (i32, i32, i32) {
    %c0_i32 = arith.constant 0 : i32
    %c0_i32_0 = arith.constant 0 : i32
    %c0_i32_1 = arith.constant 0 : i32
    return %arg0, %c0_i32, %c0_i32_0 : i32, i32, i32
  }
  func.func @transform_1(%arg0: i32) -> (i32, i32) {
    %c0_i32 = arith.constant 0 : i32
    %c0_i32_0 = arith.constant 0 : i32
    %c0_i32_1 = arith.constant 0 : i32
    return %c0_i32, %c0_i32_0 : i32, i32
  }
  func.func @transform_2(%arg0: i32) -> (i32, i32) {
    %c0_i32 = arith.constant 0 : i32
    %c0_i32_0 = arith.constant 0 : i32
    %c0_i32_1 = arith.constant 0 : i32
    return %c0_i32, %c0_i32_0 : i32, i32
  }
  func.func @transform_3(%arg0: i32) -> (i32, i32) {
    %c0_i32 = arith.constant 0 : i32
    %c0_i32_0 = arith.constant 0 : i32
    %c0_i32_1 = arith.constant 0 : i32
    return %c0_i32, %c0_i32_0 : i32, i32
  }
  func.func @transform_4(%arg0: i32) -> (i32, i32) {
    %c0_i32 = arith.constant 0 : i32
    %c0_i32_0 = arith.constant 0 : i32
    %c0_i32_1 = arith.constant 0 : i32
    return %c0_i32, %c0_i32_0 : i32, i32
  }
  func.func @transform_5(%arg0: i32) -> (i32, i32) {
    %c0_i32 = arith.constant 0 : i32
    %c0_i32_0 = arith.constant 0 : i32
    %c0_i32_1 = arith.constant 0 : i32
    return %c0_i32, %c0_i32_0 : i32, i32
  }
  func.func @transform_6(%arg0: i32) -> (i32, i32) {
    %c0_i32 = arith.constant 0 : i32
    %c0_i32_0 = arith.constant 0 : i32
    %c0_i32_1 = arith.constant 0 : i32
    return %c0_i32, %c0_i32_0 : i32, i32
  }
  func.func @transform_7(%arg0: i32) -> (i32, i32) {
    %c0_i32 = arith.constant 0 : i32
    %c0_i32_0 = arith.constant 0 : i32
    %c0_i32_1 = arith.constant 0 : i32
    return %c0_i32, %c0_i32_0 : i32, i32
  }
  func.func @transform_8(%arg0: i32) -> (i32, i32, i32) {
    %c0_i32 = arith.constant 0 : i32
    %c0_i32_0 = arith.constant 0 : i32
    %c0_i32_1 = arith.constant 0 : i32
    return %arg0, %c0_i32, %c0_i32_0 : i32, i32, i32
  }
}

module attributes {stable_mosaic.version = 11 : i64} {
  func.func @_pool_kernel(%arg0: i32, %arg1: memref<2x16x32xbf16, #tpu.memory_space<vmem>>, %arg2: memref<2x1x32xf32, #tpu.memory_space<vmem>>) attributes {dimension_semantics = [#tpu.dimension_semantics<parallel>], iteration_bounds = array<i64: 1>, scalar_prefetch = 0 : i64, scratch_operands = 0 : i64, tpu.core_type = #tpu.core_type<tc>, window_params = [{transform_indices = @transform_0, window_bounds = array<i64: 2, 16, 32>}, {transform_indices = @transform_1, window_bounds = array<i64: 2, 1, 32>}]} {
    %c0 = arith.constant 0 : index
    %c0_0 = arith.constant 0 : index
    %c0_1 = arith.constant 0 : index
    %0 = vector.load %arg1[%c0, %c0_0, %c0_1] : memref<2x16x32xbf16, #tpu.memory_space<vmem>>, vector<2x16x32xbf16>
    %1 = arith.extf %0 : vector<2x16x32xbf16> to vector<2x16x32xf32>
    %cst = arith.constant dense<0.000000e+00> : vector<2x32xf32>
    %2 = vector.multi_reduction <add>, %1, %cst [1] : vector<2x16x32xf32> to vector<2x32xf32>
    %3 = vector.shape_cast %2 : vector<2x32xf32> to vector<2x1x32xf32>
    %cst_2 = arith.constant 1.600000e+01 : f32
    %4 = vector.broadcast %cst_2 : f32 to vector<2x1x32xf32>
    %5 = arith.divf %3, %4 : vector<2x1x32xf32>
    %c0_3 = arith.constant 0 : index
    %c0_4 = arith.constant 0 : index
    %c0_5 = arith.constant 0 : index
    %6 = vector.load %arg2[%c0_3, %c0_4, %c0_5] : memref<2x1x32xf32, #tpu.memory_space<vmem>>, vector<2x1x32xf32>
    tpu.vector_store %arg2[%c0_3, %c0_4, %c0_5], %5 {strides = array<i32>} : memref<2x1x32xf32, #tpu.memory_space<vmem>>, vector<2x1x32xf32>,
    return
  }
  func.func @transform_0(%arg0: i32) -> (i32, i32, i32) {
    %c0_i32 = arith.constant 0 : i32
    %c0_i32_0 = arith.constant 0 : i32
    %c0_i32_1 = arith.constant 0 : i32
    return %arg0, %c0_i32, %c0_i32_0 : i32, i32, i32
  }
  func.func @transform_1(%arg0: i32) -> (i32, i32, i32) {
    %c0_i32 = arith.constant 0 : i32
    %c0_i32_0 = arith.constant 0 : i32
    %c0_i32_1 = arith.constant 0 : i32
    return %arg0, %c0_i32, %c0_i32_0 : i32, i32, i32
  }
}

module attributes {stable_mosaic.version = 11 : i64} {
  func.func @_patch_embed_kernel(%arg0: i32, %arg1: memref<2x16x128xbf16, #tpu.memory_space<vmem>>, %arg2: memref<128x32xbf16, #tpu.memory_space<vmem>>, %arg3: memref<1x32xf32, #tpu.memory_space<vmem>>, %arg4: memref<16x32xf32, #tpu.memory_space<vmem>>, %arg5: memref<2x16x32xbf16, #tpu.memory_space<vmem>>) attributes {dimension_semantics = [#tpu.dimension_semantics<parallel>], iteration_bounds = array<i64: 1>, scalar_prefetch = 0 : i64, scratch_operands = 0 : i64, tpu.core_type = #tpu.core_type<tc>, window_params = [{transform_indices = @transform_0, window_bounds = array<i64: 2, 16, 128>}, {pipeline_mode = #tpu.pipeline_mode<synchronous>, transform_indices = @transform_1, window_bounds = array<i64: 128, 32>}, {pipeline_mode = #tpu.pipeline_mode<synchronous>, transform_indices = @transform_2, window_bounds = array<i64: 1, 32>}, {pipeline_mode = #tpu.pipeline_mode<synchronous>, transform_indices = @transform_3, window_bounds = array<i64: 16, 32>}, {transform_indices = @transform_4, window_bounds = array<i64: 2, 16, 32>}]} {
    %c0 = arith.constant 0 : index
    %c0_0 = arith.constant 0 : index
    %c0_1 = arith.constant 0 : index
    %0 = vector.load %arg1[%c0, %c0_0, %c0_1] : memref<2x16x128xbf16, #tpu.memory_space<vmem>>, vector<2x16x128xbf16>
    %1 = vector.shape_cast %0 : vector<2x16x128xbf16> to vector<32x128xbf16>
    %c0_2 = arith.constant 0 : index
    %c0_3 = arith.constant 0 : index
    %2 = vector.load %arg2[%c0_2, %c0_3] : memref<128x32xbf16, #tpu.memory_space<vmem>>, vector<128x32xbf16>
    %cst = arith.constant dense<0.000000e+00> : vector<32x32xf32>
    %3 = tpu.matmul %1, %2, %cst {dimension_numbers = #tpu.dot_dimension_numbers<[1], [0], [0], [1], [0, 0, 1, 1], [], []>} : vector<32x128xbf16>, vector<128x32xbf16>, vector<32x32xf32> -> vector<32x32xf32>
    %c0_4 = arith.constant 0 : index
    %c0_5 = arith.constant 0 : index
    %4 = vector.load %arg3[%c0_4, %c0_5] : memref<1x32xf32, #tpu.memory_space<vmem>>, vector<1x32xf32>
    %5 = vector.broadcast %4 : vector<1x32xf32> to vector<32x32xf32>
    %6 = arith.addf %3, %5 : vector<32x32xf32>
    %7 = vector.shape_cast %6 : vector<32x32xf32> to vector<2x16x32xf32>
    %c0_6 = arith.constant 0 : index
    %c0_7 = arith.constant 0 : index
    %8 = vector.load %arg4[%c0_6, %c0_7] : memref<16x32xf32, #tpu.memory_space<vmem>>, vector<16x32xf32>
    %9 = vector.shape_cast %8 : vector<16x32xf32> to vector<1x16x32xf32>
    %10 = vector.broadcast %9 : vector<1x16x32xf32> to vector<2x16x32xf32>
    %11 = arith.addf %7, %10 : vector<2x16x32xf32>
    %12 = arith.truncf %11 : vector<2x16x32xf32> to vector<2x16x32xbf16>
    %c0_8 = arith.constant 0 : index
    %c0_9 = arith.constant 0 : index
    %c0_10 = arith.constant 0 : index
    %13 = vector.load %arg5[%c0_8, %c0_9, %c0_10] : memref<2x16x32xbf16, #tpu.memory_space<vmem>>, vector<2x16x32xbf16>
    tpu.vector_store %arg5[%c0_8, %c0_9, %c0_10], %12 {strides = array<i32>} : memref<2x16x32xbf16, #tpu.memory_space<vmem>>, vector<2x16x32xbf16>,
    return
  }
  func.func @transform_0(%arg0: i32) -> (i32, i32, i32) {
    %c0_i32 = arith.constant 0 : i32
    %c0_i32_0 = arith.constant 0 : i32
    %c0_i32_1 = arith.constant 0 : i32
    return %arg0, %c0_i32, %c0_i32_0 : i32, i32, i32
  }
  func.func @transform_1(%arg0: i32) -> (i32, i32) {
    %c0_i32 = arith.constant 0 : i32
    %c0_i32_0 = arith.constant 0 : i32
    %c0_i32_1 = arith.constant 0 : i32
    return %c0_i32, %c0_i32_0 : i32, i32
  }
  func.func @transform_2(%arg0: i32) -> (i32, i32) {
    %c0_i32 = arith.constant 0 : i32
    %c0_i32_0 = arith.constant 0 : i32
    %c0_i32_1 = arith.constant 0 : i32
    return %c0_i32, %c0_i32_0 : i32, i32
  }
  func.func @transform_3(%arg0: i32) -> (i32, i32) {
    %c0_i32 = arith.constant 0 : i32
    %c0_i32_0 = arith.constant 0 : i32
    %c0_i32_1 = arith.constant 0 : i32
    return %c0_i32, %c0_i32_0 : i32, i32
  }
  func.func @transform_4(%arg0: i32) -> (i32, i32, i32) {
    %c0_i32 = arith.constant 0 : i32
    %c0_i32_0 = arith.constant 0 : i32
    %c0_i32_1 = arith.constant 0 : i32
    return %arg0, %c0_i32, %c0_i32_0 : i32, i32, i32
  }
}

module attributes {stable_mosaic.version = 11 : i64} {
  func.func @_head_kernel(%arg0: i32, %arg1: memref<2x32xf32, #tpu.memory_space<vmem>>, %arg2: memref<1x32xf32, #tpu.memory_space<vmem>>, %arg3: memref<1x32xf32, #tpu.memory_space<vmem>>, %arg4: memref<32x128xbf16, #tpu.memory_space<vmem>>, %arg5: memref<1x128xf32, #tpu.memory_space<vmem>>, %arg6: memref<2x128xf32, #tpu.memory_space<vmem>>) attributes {dimension_semantics = [#tpu.dimension_semantics<arbitrary>], iteration_bounds = array<i64: 1>, scalar_prefetch = 0 : i64, scratch_operands = 0 : i64, tpu.core_type = #tpu.core_type<tc>, window_params = [{pipeline_mode = #tpu.pipeline_mode<synchronous>, transform_indices = @transform_0, window_bounds = array<i64: 2, 32>}, {pipeline_mode = #tpu.pipeline_mode<synchronous>, transform_indices = @transform_1, window_bounds = array<i64: 1, 32>}, {pipeline_mode = #tpu.pipeline_mode<synchronous>, transform_indices = @transform_2, window_bounds = array<i64: 1, 32>}, {pipeline_mode = #tpu.pipeline_mode<synchronous>, transform_indices = @transform_3, window_bounds = array<i64: 32, 128>}, {pipeline_mode = #tpu.pipeline_mode<synchronous>, transform_indices = @transform_4, window_bounds = array<i64: 1, 128>}, {pipeline_mode = #tpu.pipeline_mode<synchronous>, transform_indices = @transform_5, window_bounds = array<i64: 2, 128>}]} {
    %c0 = arith.constant 0 : index
    %c0_0 = arith.constant 0 : index
    %0 = vector.load %arg1[%c0, %c0_0] : memref<2x32xf32, #tpu.memory_space<vmem>>, vector<2x32xf32>
    %cst = arith.constant dense<0.000000e+00> : vector<2xf32>
    %1 = vector.multi_reduction <add>, %0, %cst [1] : vector<2x32xf32> to vector<2xf32>
    %2 = vector.shape_cast %1 : vector<2xf32> to vector<2x1xf32>
    %cst_1 = arith.constant 3.200000e+01 : f32
    %3 = vector.broadcast %cst_1 : f32 to vector<2x1xf32>
    %4 = arith.divf %2, %3 : vector<2x1xf32>
    %5 = vector.broadcast %4 : vector<2x1xf32> to vector<2x32xf32>
    %6 = arith.subf %0, %5 : vector<2x32xf32>
    %7 = vector.broadcast %4 : vector<2x1xf32> to vector<2x32xf32>
    %8 = arith.subf %0, %7 : vector<2x32xf32>
    %9 = arith.mulf %6, %8 : vector<2x32xf32>
    %cst_2 = arith.constant dense<0.000000e+00> : vector<2xf32>
    %10 = vector.multi_reduction <add>, %9, %cst_2 [1] : vector<2x32xf32> to vector<2xf32>
    %11 = vector.shape_cast %10 : vector<2xf32> to vector<2x1xf32>
    %cst_3 = arith.constant 3.200000e+01 : f32
    %12 = vector.broadcast %cst_3 : f32 to vector<2x1xf32>
    %13 = arith.divf %11, %12 : vector<2x1xf32>
    %14 = vector.broadcast %4 : vector<2x1xf32> to vector<2x32xf32>
    %15 = arith.subf %0, %14 : vector<2x32xf32>
    %cst_4 = arith.constant 9.99999974E-6 : f32
    %16 = vector.broadcast %cst_4 : f32 to vector<2x1xf32>
    %17 = arith.addf %13, %16 : vector<2x1xf32>
    %18 = math.rsqrt %17 : vector<2x1xf32>
    %19 = vector.broadcast %18 : vector<2x1xf32> to vector<2x32xf32>
    %20 = arith.mulf %15, %19 : vector<2x32xf32>
    %c0_5 = arith.constant 0 : index
    %c0_6 = arith.constant 0 : index
    %21 = vector.load %arg2[%c0_5, %c0_6] : memref<1x32xf32, #tpu.memory_space<vmem>>, vector<1x32xf32>
    %22 = vector.broadcast %21 : vector<1x32xf32> to vector<2x32xf32>
    %23 = arith.mulf %20, %22 : vector<2x32xf32>
    %c0_7 = arith.constant 0 : index
    %c0_8 = arith.constant 0 : index
    %24 = vector.load %arg3[%c0_7, %c0_8] : memref<1x32xf32, #tpu.memory_space<vmem>>, vector<1x32xf32>
    %25 = vector.broadcast %24 : vector<1x32xf32> to vector<2x32xf32>
    %26 = arith.addf %23, %25 : vector<2x32xf32>
    %27 = arith.truncf %26 : vector<2x32xf32> to vector<2x32xbf16>
    %c0_9 = arith.constant 0 : index
    %c0_10 = arith.constant 0 : index
    %28 = vector.load %arg4[%c0_9, %c0_10] : memref<32x128xbf16, #tpu.memory_space<vmem>>, vector<32x128xbf16>
    %cst_11 = arith.constant dense<0.000000e+00> : vector<2x128xf32>
    %29 = tpu.matmul %27, %28, %cst_11 {dimension_numbers = #tpu.dot_dimension_numbers<[1], [0], [0], [1], [0, 0, 1, 1], [], []>} : vector<2x32xbf16>, vector<32x128xbf16>, vector<2x128xf32> -> vector<2x128xf32>
    %c0_12 = arith.constant 0 : index
    %c0_13 = arith.constant 0 : index
    %30 = vector.load %arg5[%c0_12, %c0_13] : memref<1x128xf32, #tpu.memory_space<vmem>>, vector<1x128xf32>
    %31 = vector.broadcast %30 : vector<1x128xf32> to vector<2x128xf32>
    %32 = arith.addf %29, %31 : vector<2x128xf32>
    %c0_14 = arith.constant 0 : index
    %c0_15 = arith.constant 0 : index
    %33 = vector.load %arg6[%c0_14, %c0_15] : memref<2x128xf32, #tpu.memory_space<vmem>>, vector<2x128xf32>
    tpu.vector_store %arg6[%c0_14, %c0_15], %32 {strides = array<i32>} : memref<2x128xf32, #tpu.memory_space<vmem>>, vector<2x128xf32>,
    return
  }
  func.func @transform_0(%arg0: i32) -> (i32, i32) {
    %c0_i32 = arith.constant 0 : i32
    %c0_i32_0 = arith.constant 0 : i32
    %c0_i32_1 = arith.constant 0 : i32
    return %c0_i32, %c0_i32_0 : i32, i32
  }
  func.func @transform_1(%arg0: i32) -> (i32, i32) {
    %c0_i32 = arith.constant 0 : i32
    %c0_i32_0 = arith.constant 0 : i32
    %c0_i32_1 = arith.constant 0 : i32
    return %c0_i32, %c0_i32_0 : i32, i32
  }
  func.func @transform_2(%arg0: i32) -> (i32, i32) {
    %c0_i32 = arith.constant 0 : i32
    %c0_i32_0 = arith.constant 0 : i32
    %c0_i32_1 = arith.constant 0 : i32
    return %c0_i32, %c0_i32_0 : i32, i32
  }
  func.func @transform_3(%arg0: i32) -> (i32, i32) {
    %c0_i32 = arith.constant 0 : i32
    %c0_i32_0 = arith.constant 0 : i32
    %c0_i32_1 = arith.constant 0 : i32
    return %c0_i32, %c0_i32_0 : i32, i32
  }
  func.func @transform_4(%arg0: i32) -> (i32, i32) {
    %c0_i32 = arith.constant 0 : i32
    %c0_i32_0 = arith.constant 0 : i32
    %c0_i32_1 = arith.constant 0 : i32
    return %c0_i32, %c0_i32_0 : i32, i32
  }
  func.func @transform_5(%arg0: i32) -> (i32, i32) {
    %c0_i32 = arith.constant 0 : i32
    %c0_i32_0 = arith.constant 0 : i32
    %c0_i32_1 = arith.constant 0 : i32
    return %c0_i32, %c0_i32_0 : i32, i32
  }
}

</mosaic_0001>

<bundles_post_ra>
// kernel: vit_forward.8
= control target key start
LH: loop header
LB: loop body
LE: loop exit
PB: predicated region body
PF: predicated region fallthrough
CT: control target
= control target key end

     0   :  { %vm16_vm0 = vcmask 261120   ;;  %vm38_vm1 = vcmask 253952   ;;  %s76_s0 = inlined_call_operand.vmem [shape: bf16[2,16,32], index: 0, kind: input, shape index: {}]   ;;  %s77_s1 = inlined_call_operand.vmem [shape: f32[2,1,32], index: 1, kind: output, shape index: {}]  }
   0x1   :  { %v46_v0 = vld [vmem:[%s76_s0] sm:$0xff]   ;;  %v53_v1 = vld [vmem:[%s76_s0 + $0x8] sm:$0xff]  }
   0x2   :  { %v47_v2 = vunpack.c.l.bf16 %v46_v0  ;;  %v48_v3 = vunpack.c.h.bf16 %v46_v0  ;;  %v51_v4 = vunpack.c.l.bf16 %v53_v1  ;;  %v52_v5 = vunpack.c.h.bf16 %v53_v1 }
   0x4   :  { %v17_v6 = vsel %vm16_vm0, %v47_v2, 0.0  ;;  %v18_v7 = vsel %vm16_vm0, %v48_v3, 0.0  ;;  %v26_v8 = vsel %vm16_vm0, %v51_v4, 0.0  ;;  %v27_v9 = vsel %vm16_vm0, %v52_v5, 0.0 }
   0x5   :  { %v19_v10 = vadd.f32 %v18_v7, %v17_v6  ;;  %v28_v11 = vadd.f32 %v27_v9, %v26_v8 }
   0x7   :  { %v20_v12 = vrot.slane %v19_v10, 4  ;;  %v29_v13 = vrot.slane %v28_v11, 4 }
   0x9   :  { %v21_v14 = vadd.f32 %v20_v12, %v19_v10  ;;  %v30_v15 = vadd.f32 %v29_v13, %v28_v11 }
   0xb   :  { %v22_v16 = vrot.slane %v21_v14, 2  ;;  %v31_v17 = vrot.slane %v30_v15, 2 }
   0xd   :  { %v23_v18 = vadd.f32 %v22_v16, %v21_v14  ;;  %v32_v19 = vadd.f32 %v31_v17, %v30_v15 }
   0xf   :  { %v24_v20 = vrot.slane %v23_v18, 1  ;;  %v33_v21 = vrot.slane %v32_v19, 1 }
  0x11   :  { %v25_v22 = vadd.f32 %v24_v20, %v23_v18  ;;  %v34_v23 = vadd.f32 %v33_v21, %v32_v19 }
  0x13   :  { %v36_v24 = vmul.f32 0.0625, %v25_v22  ;;  %v37_v25 = vmul.f32 0.0625, %v34_v23 }
  0x15   :  { %39 = vst.msk [vmem:[%s77_s1] sm:$0x1] %vm38_vm1, %v36_v24  ;;  %40 = vst.msk [vmem:[%s77_s1 + $0x1] sm:$0x1] %vm38_vm1, %v37_v25 }

// kernel: vit_forward.9
= control target key start
LH: loop header
LB: loop body
LE: loop exit
PB: predicated region body
PF: predicated region fallthrough
CT: control target
= control target key end

     0   :  { %vm23_vm0 = vcmask 254976   ;;  %s248_s0 = inlined_call_operand.vmem [shape: f32[2,32], index: 0, kind: input, shape index: {}]   ;;  %s249_s1 = inlined_call_operand.vmem [shape: f32[1,32], index: 1, kind: input, shape index: {}]   ;;  %s250_s2 = inlined_call_operand.vmem [shape: f32[1,32], index: 2, kind: input, shape index: {}]   ;;  %s251_s3 = inlined_call_operand.vmem [shape: bf16[32,128], index: 3, kind: input, shape index: {}]   ;;  %s252_s4 = inlined_call_operand.vmem [shape: f32[1,128], index: 4, kind: input, shape index: {}]   ;;  %s253_s5 = inlined_call_operand.hbm [shape: f32[2,128], index: 5, kind: output, shape index: {}]  }
   0x1   :  { %v22_v0 = vld [vmem:[%s248_s0] sm:$0x3] }
   0x2   :  { %v24_v1 = vsel %vm23_vm0, %v22_v0, 0.0 }
   0x3   :  { %25 = vadd.xlane.f32.xlu0 %v24_v1 }
   0x4   :  { %10 = vsyncpa [#allocation3], 0  ;;  %v157_v7 = vld [vmem:[%s251_s3] sm:$0xff]   ;;  %v185_v8 = vmov 0.0   ;;  %v158_v9 = vld [vmem:[%s251_s3 + $0x8] sm:$0xff]   ;;  %vm186_vm1 = vmmov 0  }
   0x5   :  { %146 = vmatprep.subr.bf16.mxu0 %v185_v8  ;;  %150 = vmatprep.mubr.msk.bf16.mxu0 %vm186_vm1, %v185_v8  ;;  %v137_v14 = vld [vmem:[%s249_s1] ss:$0 sm:$0xff]  ;;  %vm78_vm2 = vcmask 261120   ;;  %s187_s28 = smov [#allocation2]  }
   0x6   :  { %147 = vmatpush3.bf16.msra.mxu0 %v157_v7  ;;  %v138_v16 = vld [vmem:[%s250_s2] ss:$0 sm:$0xff]  ;;  %s129_s29 = sshll.u32 %s187_s28, 4  ;;  %s130_s29 = int_to_ptr.vmem [resolvable:$true] %s129_s29 }
   0x7   :  { %148 = vmatprep.subr.bf16.mxu0 %v185_v8  ;;  %v139_v20 = vld [vmem:[%s252_s4] ss:$0 sm:$0xff]  ;;  %s161_s1 = scalar_lea.vmem %s130_s29, 32  ;;  %p166_p1 = scmp.lt.s32.totalorder %s130_s29, %s130_s29 }
   0x8   :  { %p162_p0 = scmp.ne.s32.totalorder %s130_s29, %s161_s1  ;;  %p167_p2 = scmp.lt.s32.totalorder %s161_s1, %s161_s1 }
   0xa   :  { %149 = vmatpush3.bf16.msra.mxu0 %v158_v9  ;;  %p168_p3 = por %p167_p2, %p166_p1 }
   0xc   :  { %p169_p4 = pnand %p168_p3, %p162_p0 }
  0x90   :  { %v26_v2 = vpop.xlane.xlu0 %25 }
  0x91   :  { %v28_v3 = vmul.f32 0.03125, %v26_v2 }
  0x93   :  { %v29_v4 = vsub.f32 %v22_v0, %v28_v3 }
  0x95   :  { %v30_v5 = vmul.f32 %v29_v4, %v29_v4 }
  0x97   :  { %v31_v6 = vsel %vm23_vm0, %v30_v5, 0.0 }
  0x98   :  { %32 = vadd.xlane.f32.xlu0 %v31_v6 }
 0x125   :  { %v33_v10 = vpop.xlane.xlu0 %32 }
 0x126   :  { %v34_v11 = vmul.f32 0.03125, %v33_v10 }
 0x128   :  { %v35_v12 = vadd.f32 1e-05, %v34_v11 }
 0x12a   :  { %159 = vrsqrt.f32 %v35_v12 }
 0x134   :  { %v160_v13 = vpop.eup %159 }
 0x135   :  { %v37_v15 = vmul.f32 %v160_v13, %v29_v4 }
 0x137   :  { %v45_v17 = vmul.f32 %v137_v14, %v37_v15 }
 0x139   :  { %v53_v18 = vadd.f32 %v138_v16, %v45_v17 }
 0x13b   :  { %v54_v19 = vpack.c.bf16 %v53_v18, %v53_v18 }
 0x13d   :  { %151 = vmatmul.mubr.msk.bf16.vlgmr.msra.gmra.mrb[0].mxu0 %vm78_vm2, %v54_v19 }
 0x210   :  { %v116_v21 = vpop.f32.mrb[0].mxu0 }
 0x211   :  { %v117_v22 = vadd.f32 %v139_v20, %v116_v21  ;;  %v152_v23 = vpop.f32.mrb[1].mxu0 }
 0x212   :  { %v119_v24 = vpop.f32.mrb[2].mxu0 }
 0x213   :  { %122 = vst [vmem:[#allocation2] sm:$0x3] %v117_v22  ;;  %v153_v25 = vpop.f32.mrb[3].mxu0 }
 0x214   :  { %172 = shalt.err (!%p169_p4)
}
 0x215   :  { %s173_s4 = scalar_lea.hbm %s253_s5, 32 }
 0x216   :  { %p174_p5 = scmp.ne.s32.totalorder %s253_s5, %s173_s4  ;;  %p177_p6 = scmp.lt.u32.totalorder %s173_s4, %s253_s5 }
 0x218   :  { %p179_p7 = pnand %p177_p6, %p174_p5 }
 0x21a   :  { %182 = shalt.err (!%p179_p7)
}
 0x21b   :  { %132 = dma.vmem_to_hbm [thread:$0]  %s130_s29, 32, %s253_s5, [#allocation3]  }
 0x21c   :  { %183 = dma.done.wait [#allocation3], 32  }
 0x21d   :  { %184 = vsyncadd [#allocation3], 4294967264 }
 0x21e   :  { %136 = vsyncpa [#allocation3], 1 }

// kernel: vit_forward.5
= control target key start
LH: loop header
LB: loop body
LE: loop exit
PB: predicated region body
PF: predicated region fallthrough
CT: control target
= control target key end

     0   :  { %vm176_vm0 = vcmask 257024   ;;  %s320_s1 = inlined_call_operand.vmem [shape: bf16[128,32], index: 1, kind: input, shape index: {}]   ;;  %s321_s0 = inlined_call_operand.vmem [shape: bf16[2,16,128], index: 0, kind: input, shape index: {}]   ;;  %s322_s2 = inlined_call_operand.vmem [shape: f32[1,32], index: 2, kind: input, shape index: {}]   ;;  %s323_s3 = inlined_call_operand.vmem [shape: f32[16,32], index: 3, kind: input, shape index: {}]   ;;  %s324_s4 = inlined_call_operand.vmem [shape: bf16[2,16,32], index: 4, kind: output, shape index: {}]  }
   0x1   :  { %v234_v0 = vld [vmem:[%s320_s1] sm:$0xff]   ;;  %v235_v1 = vld [vmem:[%s320_s1 + $0x8] sm:$0xff]   ;;  %v236_v2 = vld [vmem:[%s320_s1 + $0x10] sm:$0xff]  }
   0x2   :  { %214 = vmatprep.subr.bf16.mxu0 %v234_v0  ;;  %v237_v3 = vld [vmem:[%s320_s1 + $0x18] sm:$0xff]   ;;  %v242_v4 = vld [vmem:[%s321_s0] sm:$0xff]   ;;  %v239_v6 = vld [vmem:[%s320_s1 + $0x28] sm:$0xff]  }
   0x3   :  { %215 = vmatpush3.bf16.msra.mxu0 %v234_v0  ;;  %230 = vmatprep.mubr.bf16.mxu0 %v242_v4  ;;  %v238_v5 = vld [vmem:[%s320_s1 + $0x20] sm:$0xff]   ;;  %v240_v7 = vld [vmem:[%s320_s1 + $0x30] sm:$0xff]   ;;  %v241_v8 = vld [vmem:[%s320_s1 + $0x38] sm:$0xff]  }
   0x4   :  { %216 = vmatprep.subr.bf16.mxu0 %v235_v1  ;;  %v243_v9 = vld [vmem:[%s321_s0 + $0x8] sm:$0xff]   ;;  %v185_v10 = vld [vmem:[%s322_s2] ss:$0 sm:$0xff] }
   0x5   :  { %v154_v12 = vld [vmem:[%s323_s3] sm:$0xff]  ;;  %v155_v17 = vld [vmem:[%s323_s3 + $0x8] sm:$0xff] }
   0x7   :  { %217 = vmatpush3.bf16.msra.mxu0 %v235_v1 }
   0x8   :  { %218 = vmatprep.subr.bf16.mxu0 %v236_v2 }
   0xb   :  { %219 = vmatpush3.bf16.msra.mxu0 %v236_v2 }
   0xc   :  { %220 = vmatprep.subr.bf16.mxu0 %v237_v3 }
   0xf   :  { %221 = vmatpush3.bf16.msra.mxu0 %v237_v3 }
  0x10   :  { %222 = vmatprep.subr.bf16.mxu0 %v238_v5 }
  0x13   :  { %223 = vmatpush3.bf16.msra.mxu0 %v238_v5 }
  0x14   :  { %224 = vmatprep.subr.bf16.mxu0 %v239_v6 }
  0x17   :  { %225 = vmatpush3.bf16.msra.mxu0 %v239_v6 }
  0x18   :  { %226 = vmatprep.subr.bf16.mxu0 %v240_v7 }
  0x1b   :  { %227 = vmatpush3.bf16.msra.mxu0 %v240_v7 }
  0x1c   :  { %228 = vmatprep.subr.bf16.mxu0 %v241_v8 }
  0x1f   :  { %229 = vmatpush3.bf16.msra.mxu0 %v241_v8 }
  0x22   :  { %231 = vmatmul.mubr.bf16.vlgmr.msra.gmra.mrb[0].mxu0 %v243_v9 }
  0xf5   :  { %v232_v11 = vpop.f32.mrb[0].mxu0 }
  0xf6   :  { %v148_v13 = vadd.f32 %v232_v11, %v185_v10  ;;  %v139_v14 = vpop.f32.mrb[1].mxu0 }
  0xf7   :  { %v140_v15 = vadd.f32 %v185_v10, %v139_v14  ;;  %v233_v16 = vpop.f32.mrb[2].mxu0 }
  0xf8   :  { %v158_v18 = vadd.f32 %v154_v12, %v148_v13  ;;  %v151_v19 = vadd.f32 %v233_v16, %v185_v10  ;;  %v142_v20 = vpop.f32.mrb[3].mxu0 }
  0xf9   :  { %v156_v21 = vadd.f32 %v154_v12, %v140_v15  ;;  %v143_v22 = vadd.f32 %v185_v10, %v142_v20 }
  0xfa   :  { %v202_v23 = vpack.c.bf16 %v158_v18, %v158_v18  ;;  %v159_v24 = vadd.f32 %v155_v17, %v151_v19 }
  0xfb   :  { %v200_v25 = vpack.c.bf16 %v156_v21, %v156_v21  ;;  %v157_v26 = vadd.f32 %v155_v17, %v143_v22 }
  0xfc   :  { %179 = vst.msk [vmem:[%s324_s4 + $0x8] sm:$0xf] %vm176_vm0, %v202_v23  ;;  %v203_v27 = vpack.c.bf16 %v159_v24, %v159_v24 }
  0xfd   :  { %177 = vst.msk [vmem:[%s324_s4] sm:$0xf] %vm176_vm0, %v200_v25  ;;  %v201_v28 = vpack.c.bf16 %v157_v26, %v157_v26 }
  0xfe   :  { %180 = vst.msk [vmem:[%s324_s4 + $0xc] sm:$0xf] %vm176_vm0, %v203_v27 }
  0xff   :  { %178 = vst.msk [vmem:[%s324_s4 + $0x4] sm:$0xf] %vm176_vm0, %v201_v28 }

// kernel: vit_forward.6
= control target key start
LH: loop header
LB: loop body
LE: loop exit
PB: predicated region body
PF: predicated region fallthrough
CT: control target
= control target key end

     0   :  { %vm43_vm0 = vcmask 261120   ;;  %v2184_v43 = vmov 0.0   ;;  %vm2185_vm1 = vmmov 0   ;;  %vm161_vm2 = vcmask 64512   ;;  %s2187_s13 = smov 64   ;;  %s2188_s14 = smov 88   ;;  %s2514_s0 = inlined_call_operand.vmem [shape: bf16[2,16,32], index: 0, kind: input, shape index: {}]   ;;  %s2515_s1 = inlined_call_operand.vmem [shape: bf16[32,96], index: 1, kind: input, shape index: {}]   ;;  %s2516_s6 = inlined_call_operand.vmem [shape: f32[1,32], index: 6, kind: input, shape index: {}]   ;;  %s2517_s2 = inlined_call_operand.vmem [shape: bf16[32,32], index: 2, kind: input, shape index: {}]   ;;  %s2518_s3 = inlined_call_operand.vmem [shape: bf16[32,128], index: 3, kind: input, shape index: {}]   ;;  %s2519_s4 = inlined_call_operand.vmem [shape: bf16[32,128], index: 4, kind: input, shape index: {}]   ;;  %s2520_s7 = inlined_call_operand.vmem [shape: f32[1,32], index: 7, kind: input, shape index: {}]   ;;  %s2521_s5 = inlined_call_operand.vmem [shape: bf16[128,32], index: 5, kind: input, shape index: {}]   ;;  %s2522_s8 = inlined_call_operand.vmem [shape: bf16[2,16,32], index: 8, kind: output, shape index: {}]  }
   0x1   :  { %v1810_v0 = vld [vmem:[%s2514_s0 + $0x8] sm:$0xff]   ;;  %v1803_v1 = vld [vmem:[%s2514_s0] sm:$0xff]   ;;  %1897 = vmatprep.subr.bf16.mxu1 %v2184_v43  ;;  %1899 = vmatprep.mubr.msk.bf16.mxu1 %vm2185_vm1, %v2184_v43  ;;  %vm259_vm3 = vcmask 130048   ;;  %s2189_s15 = smov 120   ;;  %vm409_vm4 = vcmask 1043456   ;;  %s2190_s18 = smov 80  }
   0x2   :  { %v1808_v2 = vunpack.c.l.bf16 %v1810_v0  ;;  %v1804_v3 = vunpack.c.l.bf16 %v1803_v1  ;;  %v1809_v4 = vunpack.c.h.bf16 %v1810_v0  ;;  %v1805_v5 = vunpack.c.h.bf16 %v1803_v1  ;;  %v2074_v14 = vld [vmem:[%s2515_s1] sm:$0xff]   ;;  %v2075_v15 = vld [vmem:[%s2515_s1 + $0x8] sm:$0xff]   ;;  %s2191_s19 = smov 112   ;;  %s2192_s20 = smov 56  }
   0x3   :  { %1877 = vmatprep.subr.bf16.mxu0 %v2074_v14  ;;  %v1744_v32 = vld [vmem:[%s2516_s6] ss:$0 sm:$0xff]  ;;  %s2186_s6 = smov 96   ;;  %s2193_s23 = smov 48   ;;  %vm1735_vm5 = vcmask 257024  }
   0x4   :  { %v41_v6 = vmul.f32 %v1808_v2, %v1808_v2  ;;  %v39_v7 = vmul.f32 %v1804_v3, %v1804_v3  ;;  %v42_v8 = vmul.f32 %v1809_v4, %v1809_v4  ;;  %v40_v9 = vmul.f32 %v1805_v5, %v1805_v5  ;;  %1878 = vmatpush3.bf16.msra.mxu0 %v2074_v14  ;;  %s2194_s24 = smov 72   ;;  %s2195_s25 = smov 104  }
   0x5   :  { %1879 = vmatprep.subr.bf16.mxu0 %v2075_v15  ;;  %s2196_s28 = smov 40  }
   0x6   :  { %v50_v10 = vsel %vm43_vm0, %v41_v6, 0.0  ;;  %v44_v11 = vsel %vm43_vm0, %v39_v7, 0.0  ;;  %v53_v12 = vsel %vm43_vm0, %v42_v8, 0.0  ;;  %v47_v13 = vsel %vm43_vm0, %v40_v9, 0.0 }
   0x7   :  { %51 = vadd.xlane.f32.xlu1 %v50_v10  ;;  %45 = vadd.xlane.f32.xlu0 %v44_v11 }
   0x8   :  { %1880 = vmatpush3.bf16.msra.mxu0 %v2075_v15 }
   0x9   :  { %1885 = vmatprep.subr.bf16.mxu0 %v2184_v43 }
   0xb   :  { %54 = vadd.xlane.f32.xlu1 %v53_v12  ;;  %48 = vadd.xlane.f32.xlu0 %v47_v13 }
  0x94   :  { %v52_v16 = vpop.xlane.xlu1 %51  ;;  %v46_v17 = vpop.xlane.xlu0 %45 }
  0x95   :  { %v59_v18 = vmul.f32 0.03125, %v52_v16  ;;  %v57_v19 = vmul.f32 0.03125, %v46_v17 }
  0x97   :  { %v63_v20 = vadd.f32 1e-06, %v59_v18  ;;  %v61_v21 = vadd.f32 1e-06, %v57_v19 }
  0x98   :  { %v55_v22 = vpop.xlane.xlu1 %54  ;;  %v49_v23 = vpop.xlane.xlu0 %48 }
  0x99   :  { %2088 = vrsqrt.f32 %v63_v20  ;;  %v60_v24 = vmul.f32 0.03125, %v55_v22  ;;  %v58_v25 = vmul.f32 0.03125, %v49_v23 }
  0x9a   :  { %2090 = vrsqrt.f32 %v61_v21 }
  0x9b   :  { %v64_v26 = vadd.f32 1e-06, %v60_v24  ;;  %v62_v27 = vadd.f32 1e-06, %v58_v25 }
  0x9d   :  { %2092 = vrsqrt.f32 %v64_v26 }
  0x9e   :  { %2094 = vrsqrt.f32 %v62_v27 }
  0xa3   :  { %v2089_v28 = vpop.eup %2088 }
  0xa4   :  { %v2091_v29 = vpop.eup %2090  ;;  %v71_v30 = vmul.f32 %v2089_v28, %v1808_v2 }
  0xa5   :  { %v69_v33 = vmul.f32 %v2091_v29, %v1804_v3 }
  0xa6   :  { %v2261_v37 = vmul.f32 %v1744_v32, %v71_v30 }
  0xa7   :  { %v2093_v31 = vpop.eup %2092  ;;  %v2265_v39 = vmul.f32 %v1744_v32, %v69_v33 }
  0xa8   :  { %v2095_v34 = vpop.eup %2094  ;;  %v72_v35 = vmul.f32 %v2093_v31, %v1809_v4 }
  0xa9   :  { %v70_v36 = vmul.f32 %v2095_v34, %v1805_v5 }
  0xaa   :  { %v2263_v38 = vmul.f32 %v1744_v32, %v72_v35 }
  0xab   :  { %v2267_v40 = vmul.f32 %v1744_v32, %v70_v36 }
  0xac   :  { %v84_v41 = vpack.c.bf16 %v2263_v38, %v2261_v37 }
  0xad   :  { %v83_v42 = vpack.c.bf16 %v2267_v40, %v2265_v39 }
  0xaf   :  { %1881 = vmatprep.mubr.msk.bf16.mxu0 %vm43_vm0, %v83_v42 }
  0xb0   :  { %1882 = vmatmul.mubr.msk.bf16.vlgmr.msra.gmra.mrb[0].mxu0 %vm43_vm0, %v84_v41 }
  0xb1   :  { %1887 = vmatprep.mubr.msk.bf16.mxu0 %vm2185_vm1, %v2184_v43 }
 0x183   :  { %v1883_v44 = vpop.f32.mrb[0].mxu0 }
 0x184   :  { %v141_v45 = vpop.f32.mrb[1].mxu0 }
 0x185   :  { %v1884_v46 = vpop.f32.mrb[2].mxu0 }
 0x186   :  { %v2281_v47 = vpack.c.bf16 %v1884_v46, %v1883_v44  ;;  %v144_v48 = vpop.f32.mrb[3].mxu0  ;;  %v402_v46 = vld [vmem:[%s2517_s2] sm:$0xf] }
 0x187   :  { %v2283_v49 = vpack.c.bf16 %v144_v48, %v141_v45  ;;  %v411_v48 = vsel %vm409_vm4, %v402_v46, 0 }
 0x188   :  { %210 = vrot.lane.b32.xlu1 %v2281_v47, %s2186_s6 }
 0x189   :  { %159 = vrot.lane.b32.xlu0 %v2283_v49, %s2186_s6 }
 0x1fa   :  { %v211_v52 = vpop.permute.xlu1 %210 }
 0x1fb   :  { %v160_v50 = vpop.permute.xlu0 %159  ;;  %v216_v53 = vsel %vm161_vm2, %v211_v52, 0 }
 0x1fc   :  { %v166_v51 = vsel %vm161_vm2, %v160_v50, 0 }
 0x1fd   :  { %1886 = vmatpush3.bf16.xpose.msra.mxu0 %v166_v51 }
 0x1fe   :  { %1891 = vmatprep.subr.bf16.mxu0 %v2184_v43 }
 0x204   :  { %1888 = vmatmul.mubr.msk.bf16.vlgmr.msra.gmra.mrb[4].mxu0 %vm161_vm2, %v2283_v49 }
 0x205   :  { %1892 = vmatpush3.bf16.xpose.msra.mxu0 %v216_v53  ;;  %1893 = vmatprep.mubr.msk.bf16.mxu0 %vm2185_vm1, %v2184_v43 }
 0x206   :  { %1903 = vmatprep.subr.bf16.mxu0 %v2184_v43 }
 0x20c   :  { %1894 = vmatmul.mubr.msk.bf16.vlgmr.msra.gmra.mrb[8].mxu0 %vm161_vm2, %v2281_v47 }
 0x20d   :  { %1905 = vmatprep.mubr.msk.bf16.mxu0 %vm2185_vm1, %v2184_v43 }
 0x2d7   :  { %v202_v54 = vpop.f32.mrb[4].mxu0 }
 0x2d8   :  { %v1889_v55 = vpop.f32.mrb[5].mxu0  ;;  %v260_v56 = vsel %vm259_vm3, %v202_v54, -inf }
 0x2d9   :  { %261 = vmax.xlane.f32.xlu1 %v260_v56  ;;  %v205_v57 = vpop.f32.mrb[6].mxu0 }
 0x2da   :  { %v1890_v58 = vpop.f32.mrb[7].mxu0  ;;  %v263_v59 = vsel %vm259_vm3, %v205_v57, -inf }
 0x2db   :  { %264 = vmax.xlane.f32.xlu0 %v263_v59 }
 0x2df   :  { %v252_v60 = vpop.f32.mrb[8].mxu0 }
 0x2e0   :  { %v1895_v61 = vpop.f32.mrb[9].mxu0  ;;  %v266_v62 = vsel %vm259_vm3, %v252_v60, -inf }
 0x2e1   :  { %267 = vmax.xlane.f32.xlu0 %v266_v62  ;;  %v255_v63 = vpop.f32.mrb[10].mxu0 }
 0x2e2   :  { %v1896_v0 = vpop.f32.mrb[11].mxu0  ;;  %v269_v1 = vsel %vm259_vm3, %v255_v63, -inf }
 0x2e3   :  { %270 = vmax.xlane.f32.xlu1 %v269_v1 }
 0x366   :  { %v262_v2 = vpop.xlane.xlu1 %261 }
 0x367   :  { %v272_v3 = vsub.f32 %v202_v54, %v262_v2 }
 0x368   :  { %v265_v4 = vpop.xlane.xlu0 %264 }
 0x369   :  { %v276_v5 = vmul.f32 1.442695, %v272_v3  ;;  %v273_v6 = vsub.f32 %v205_v57, %v265_v4 }
 0x36b   :  { %2096 = vpow2.f32 %v276_v5  ;;  %v278_v7 = vmul.f32 1.442695, %v273_v6 }
 0x36d   :  { %2098 = vpow2.f32 %v278_v7 }
 0x36e   :  { %v268_v8 = vpop.xlane.xlu0 %267 }
 0x36f   :  { %v274_v9 = vsub.f32 %v252_v60, %v268_v8 }
 0x370   :  { %v271_v10 = vpop.xlane.xlu1 %270 }
 0x371   :  { %v280_v11 = vmul.f32 1.442695, %v274_v9  ;;  %v275_v12 = vsub.f32 %v255_v63, %v271_v10 }
 0x373   :  { %2100 = vpow2.f32 %v280_v11  ;;  %v282_v13 = vmul.f32 1.442695, %v275_v12 }
 0x375   :  { %v2097_v14 = vpop.eup %2096  ;;  %2102 = vpow2.f32 %v282_v13 }
 0x376   :  { %v284_v15 = vsel %vm259_vm3, %v2097_v14, 0.0 }
 0x377   :  { %v2099_v16 = vpop.eup %2098  ;;  %285 = vadd.xlane.f32.xlu0 %v284_v15 }
 0x378   :  { %v287_v17 = vsel %vm259_vm3, %v2099_v16, 0.0 }
 0x379   :  { %288 = vadd.xlane.f32.xlu1 %v287_v17 }
 0x37d   :  { %v2101_v18 = vpop.eup %2100 }
 0x37e   :  { %v290_v19 = vsel %vm259_vm3, %v2101_v18, 0.0 }
 0x37f   :  { %v2103_v20 = vpop.eup %2102  ;;  %291 = vadd.xlane.f32.xlu0 %v290_v19 }
 0x380   :  { %v293_v21 = vsel %vm259_vm3, %v2103_v20, 0.0 }
 0x381   :  { %294 = vadd.xlane.f32.xlu1 %v293_v21 }
 0x392   :  { %353 = vrot.lane.b32.xlu1 %v2281_v47, %s2187_s13 }
 0x395   :  { %306 = vrot.lane.b32.xlu0 %v2283_v49, %s2187_s13 }
 0x396   :  { %468 = vrot.lane.b32.xlu1 %v2283_v49, %s2188_s14 }
 0x399   :  { %519 = vrot.lane.b32.xlu0 %v2281_v47, %s2188_s14 }
 0x39a   :  { %466 = vrot.lane.b32.xlu1 %v2283_v49, %s2189_s15 }
 0x39e   :  { %517 = vrot.lane.b32.xlu1 %v2281_v47, %s2189_s15 }
 0x404   :  { %v286_v22 = vpop.xlane.xlu0 %285 }
 0x405   :  { %2104 = vrcp.f32 %v286_v22 }
 0x406   :  { %v289_v23 = vpop.xlane.xlu1 %288 }
 0x407   :  { %2106 = vrcp.f32 %v289_v23 }
 0x40c   :  { %v292_v24 = vpop.xlane.xlu0 %291 }
 0x40d   :  { %2108 = vrcp.f32 %v292_v24 }
 0x40e   :  { %v295_v25 = vpop.xlane.xlu1 %294 }
 0x40f   :  { %v2105_v26 = vpop.eup %2104  ;;  %2110 = vrcp.f32 %v295_v25 }
 0x410   :  { %v307_v27 = vpop.permute.xlu0 %306  ;;  %v300_v30 = vmul.f32 %v2105_v26, %v2097_v14 }
 0x411   :  { %v2107_v28 = vpop.eup %2106  ;;  %1898 = vmatpush3.bf16.msra.mxu1 %v307_v27 }
 0x412   :  { %v354_v29 = vpop.permute.xlu1 %353  ;;  %v301_v31 = vmul.f32 %v2107_v28, %v2099_v16  ;;  %2057 = vmatprep.subr.msk.bf16.mxu1 %vm409_vm4, %v402_v46 }
 0x413   :  { %1904 = vmatpush3.bf16.msra.mxu0 %v354_v29 }
 0x414   :  { %v304_v32 = vpack.c.bf16 %v301_v31, %v300_v30  ;;  %1915 = vmatprep.subr.bf16.mxu0 %v2184_v43  ;;  %v520_v57 = vpop.permute.xlu0 %519 }
 0x415   :  { %v525_v61 = vsel %vm161_vm2, %v520_v57, 0 }
 0x416   :  { %1900 = vmatmul.mubr.msk.bf16.vlgmr.msra.gmra.mrb[0].mxu1 %vm259_vm3, %v304_v32  ;;  %v469_v41 = vpop.permute.xlu1 %468 }
 0x417   :  { %v2109_v33 = vpop.eup %2108  ;;  %v474_v44 = vsel %vm161_vm2, %v469_v41, 0  ;;  %1910 = vmatpush3.bf16.msra.mxu1 %v411_v48 }
 0x418   :  { %v302_v35 = vmul.f32 %v2109_v33, %v2101_v18  ;;  %1921 = vmatprep.subr.bf16.mxu1 %v2184_v43 }
 0x419   :  { %v2111_v34 = vpop.eup %2110 }
 0x41a   :  { %v303_v36 = vmul.f32 %v2111_v34, %v2103_v20  ;;  %v467_v45 = vpop.permute.xlu1 %466 }
 0x41c   :  { %v305_v42 = vpack.c.bf16 %v303_v36, %v302_v35 }
 0x41e   :  { %1906 = vmatmul.mubr.msk.bf16.vlgmr.msra.gmra.mrb[12].mxu0 %vm259_vm3, %v305_v42  ;;  %v518_v4 = vpop.permute.xlu1 %517 }
 0x41f   :  { %1916 = vmatpush3.bf16.xpose.msra.mxu0 %v474_v44  ;;  %1917 = vmatprep.mubr.msk.bf16.mxu0 %vm2185_vm1, %v2184_v43 }
 0x420   :  { %1927 = vmatprep.subr.bf16.mxu0 %v2184_v43 }
 0x426   :  { %1918 = vmatmul.mubr.msk.bf16.vlgmr.msra.gmra.mrb[16].mxu0 %vm161_vm2, %v467_v45 }
 0x427   :  { %1929 = vmatprep.mubr.msk.bf16.mxu0 %vm2185_vm1, %v2184_v43 }
 0x4e9   :  { %v346_v50 = vpop.f32.mrb[0].mxu1 }
 0x4ea   :  { %v1901_v51 = vpop.f32.mrb[1].mxu1 }
 0x4eb   :  { %v349_v52 = vpop.f32.mrb[2].mxu1 }
 0x4ec   :  { %v400_v53 = vpack.c.bf16 %v349_v52, %v346_v50  ;;  %v1902_v54 = vpop.f32.mrb[3].mxu1 }
 0x4ee   :  { %1911 = vmatprep.mubr.msk.bf16.mxu1 %vm161_vm2, %v400_v53 }
 0x4f1   :  { %v393_v55 = vpop.f32.mrb[12].mxu0 }
 0x4f2   :  { %v1907_v56 = vpop.f32.mrb[13].mxu0 }
 0x4f3   :  { %v396_v58 = vpop.f32.mrb[14].mxu0 }
 0x4f4   :  { %v401_v59 = vpack.c.bf16 %v396_v58, %v393_v55  ;;  %v1908_v60 = vpop.f32.mrb[15].mxu0 }
 0x4f6   :  { %1912 = vmatmul.mubr.msk.bf16.vlgmr.msra.gmra.mrb[4].mxu1 %vm161_vm2, %v401_v59 }
 0x4f7   :  { %1922 = vmatpush3.bf16.xpose.msra.mxu1 %v525_v61  ;;  %1923 = vmatprep.mubr.msk.bf16.mxu1 %vm2185_vm1, %v2184_v43 }
 0x4f8   :  { %1933 = vmatprep.subr.bf16.mxu1 %v2184_v43 }
 0x4f9   :  { %v510_v62 = vpop.f32.mrb[16].mxu0 }
 0x4fa   :  { %v1919_v63 = vpop.f32.mrb[17].mxu0  ;;  %v568_v0 = vsel %vm259_vm3, %v510_v62, -inf }
 0x4fb   :  { %569 = vmax.xlane.f32.xlu0 %v568_v0  ;;  %v513_v1 = vpop.f32.mrb[18].mxu0 }
 0x4fc   :  { %v1920_v2 = vpop.f32.mrb[19].mxu0  ;;  %v571_v3 = vsel %vm259_vm3, %v513_v1, -inf }
 0x4fd   :  { %572 = vmax.xlane.f32.xlu1 %v571_v3 }
 0x4fe   :  { %1924 = vmatmul.mubr.msk.bf16.vlgmr.msra.gmra.mrb[8].mxu1 %vm161_vm2, %v518_v4 }
 0x4ff   :  { %1935 = vmatprep.mubr.msk.bf16.mxu1 %vm2185_vm1, %v2184_v43 }
 0x50e   :  { %775 = vrot.lane.b32.xlu1 %v2283_v49, %s2190_s18 }
 0x512   :  { %773 = vrot.lane.b32.xlu1 %v2283_v49, %s2191_s19 }
 0x516   :  { %826 = vrot.lane.b32.xlu1 %v2281_v47, %s2190_s18 }
 0x588   :  { %v570_v5 = vpop.xlane.xlu0 %569 }
 0x589   :  { %v580_v6 = vsub.f32 %v510_v62, %v570_v5 }
 0x58a   :  { %v573_v7 = vpop.xlane.xlu1 %572 }
 0x58b   :  { %v584_v8 = vmul.f32 1.442695, %v580_v6  ;;  %v581_v9 = vsub.f32 %v513_v1, %v573_v7 }
 0x58d   :  { %2112 = vpow2.f32 %v584_v8  ;;  %v586_v10 = vmul.f32 1.442695, %v581_v9 }
 0x58e   :  { %v776_v25 = vpop.permute.xlu1 %775 }
 0x58f   :  { %2114 = vpow2.f32 %v586_v10  ;;  %v781_v31 = vsel %vm161_vm2, %v776_v25, 0 }
 0x592   :  { %v774_v30 = vpop.permute.xlu1 %773 }
 0x596   :  { %v827_v32 = vpop.permute.xlu1 %826 }
 0x597   :  { %v2113_v11 = vpop.eup %2112  ;;  %v832_v33 = vsel %vm161_vm2, %v827_v32, 0 }
 0x598   :  { %v592_v12 = vsel %vm259_vm3, %v2113_v11, 0.0 }
 0x599   :  { %v2115_v13 = vpop.eup %2114  ;;  %593 = vadd.xlane.f32.xlu0 %v592_v12 }
 0x59a   :  { %v595_v14 = vsel %vm259_vm3, %v2115_v13, 0.0 }
 0x59d   :  { %596 = vadd.xlane.f32.xlu0 %v595_v14 }
 0x5b3   :  { %614 = vrot.lane.b32.xlu0 %v2283_v49, %s2192_s20 }
 0x5b7   :  { %824 = vrot.lane.b32.xlu0 %v2281_v47, %s2191_s19 }
 0x5d1   :  { %v561_v15 = vpop.f32.mrb[8].mxu1 }
 0x5d2   :  { %v1925_v16 = vpop.f32.mrb[9].mxu1  ;;  %v574_v17 = vsel %vm259_vm3, %v561_v15, -inf }
 0x5d3   :  { %v564_v18 = vpop.f32.mrb[10].mxu1  ;;  %575 = vmax.xlane.f32.xlu1 %v574_v17 }
 0x5d4   :  { %v1926_v19 = vpop.f32.mrb[11].mxu1  ;;  %v577_v20 = vsel %vm259_vm3, %v564_v18, -inf }
 0x5d6   :  { %578 = vmax.xlane.f32.xlu0 %v577_v20 }
 0x5e4   :  { %661 = vrot.lane.b32.xlu1 %v2281_v47, %s2192_s20 }
 0x626   :  { %v594_v21 = vpop.xlane.xlu0 %593 }
 0x627   :  { %2116 = vrcp.f32 %v594_v21 }
 0x62a   :  { %v597_v22 = vpop.xlane.xlu0 %596 }
 0x62b   :  { %2118 = vrcp.f32 %v597_v22 }
 0x62e   :  { %v615_v23 = vpop.permute.xlu0 %614 }
 0x62f   :  { %1928 = vmatpush3.bf16.msra.mxu0 %v615_v23 }
 0x630   :  { %1945 = vmatprep.subr.bf16.mxu0 %v2184_v43 }
 0x631   :  { %v2117_v24 = vpop.eup %2116 }
 0x632   :  { %v608_v27 = vmul.f32 %v2117_v24, %v2113_v11  ;;  %v825_v34 = vpop.permute.xlu0 %824 }
 0x635   :  { %v2119_v26 = vpop.eup %2118 }
 0x636   :  { %v609_v28 = vmul.f32 %v2119_v26, %v2115_v13  ;;  %v710_v13 = vld [vmem:[%s2517_s2 + $0x4] sm:$0xf] }
 0x637   :  { %v718_v14 = vsel %vm409_vm4, %v710_v13, 0 }
 0x638   :  { %v612_v29 = vpack.c.bf16 %v609_v28, %v608_v27 }
 0x63a   :  { %1930 = vmatmul.mubr.msk.bf16.vlgmr.msra.gmra.mrb[20].mxu0 %vm259_vm3, %v612_v29 }
 0x63b   :  { %1946 = vmatpush3.bf16.xpose.msra.mxu0 %v781_v31  ;;  %1947 = vmatprep.mubr.msk.bf16.mxu0 %vm2185_vm1, %v2184_v43 }
 0x63c   :  { %1951 = vmatprep.subr.bf16.mxu0 %v2184_v43 }
 0x642   :  { %1948 = vmatmul.mubr.msk.bf16.vlgmr.msra.gmra.mrb[24].mxu0 %vm161_vm2, %v774_v30 }
 0x643   :  { %1952 = vmatpush3.bf16.xpose.msra.mxu0 %v832_v33  ;;  %1953 = vmatprep.mubr.msk.bf16.mxu0 %vm2185_vm1, %v2184_v43 }
 0x644   :  { %1963 = vmatprep.subr.bf16.mxu0 %v2184_v43 }
 0x64a   :  { %1954 = vmatmul.mubr.msk.bf16.vlgmr.msra.gmra.mrb[28].mxu0 %vm161_vm2, %v825_v34 }
 0x64b   :  { %1965 = vmatprep.mubr.msk.bf16.mxu0 %vm2185_vm1, %v2184_v43 }
 0x660   :  { %v576_v35 = vpop.xlane.xlu1 %575 }
 0x661   :  { %v582_v36 = vsub.f32 %v561_v15, %v576_v35 }
 0x663   :  { %v588_v41 = vmul.f32 1.442695, %v582_v36  ;;  %v579_v42 = vpop.xlane.xlu0 %578 }
 0x664   :  { %v583_v44 = vsub.f32 %v564_v18, %v579_v42  ;;  %v662_v45 = vpop.permute.xlu1 %661 }
 0x665   :  { %2120 = vpow2.f32 %v588_v41  ;;  %1934 = vmatpush3.bf16.msra.mxu1 %v662_v45 }
 0x666   :  { %v590_v46 = vmul.f32 1.442695, %v583_v44  ;;  %2058 = vmatprep.subr.msk.bf16.mxu1 %vm409_vm4, %v710_v13 }
 0x668   :  { %2122 = vpow2.f32 %v590_v46 }
 0x66f   :  { %v2121_v48 = vpop.eup %2120 }
 0x670   :  { %v598_v50 = vsel %vm259_vm3, %v2121_v48, 0.0 }
 0x671   :  { %599 = vadd.xlane.f32.xlu0 %v598_v50 }
 0x672   :  { %v2123_v51 = vpop.eup %2122 }
 0x673   :  { %v601_v52 = vsel %vm259_vm3, %v2123_v51, 0.0 }
 0x675   :  { %602 = vadd.xlane.f32.xlu0 %v601_v52 }
 0x6fe   :  { %v600_v53 = vpop.xlane.xlu0 %599 }
 0x6ff   :  { %2124 = vrcp.f32 %v600_v53 }
 0x702   :  { %v603_v54 = vpop.xlane.xlu0 %602 }
 0x703   :  { %2126 = vrcp.f32 %v603_v54 }
 0x709   :  { %v2125_v55 = vpop.eup %2124 }
 0x70a   :  { %v610_v58 = vmul.f32 %v2125_v55, %v2121_v48 }
 0x70d   :  { %v2127_v56 = vpop.eup %2126  ;;  %v654_v57 = vpop.f32.mrb[20].mxu0 }
 0x70e   :  { %v611_v59 = vmul.f32 %v2127_v56, %v2123_v51  ;;  %v1931_v60 = vpop.f32.mrb[21].mxu0 }
 0x70f   :  { %v657_v61 = vpop.f32.mrb[22].mxu0 }
 0x710   :  { %v708_v62 = vpack.c.bf16 %v657_v61, %v654_v57  ;;  %v1932_v63 = vpop.f32.mrb[23].mxu0  ;;  %v613_v0 = vpack.c.bf16 %v611_v59, %v610_v58 }
 0x712   :  { %1936 = vmatmul.mubr.msk.bf16.vlgmr.msra.gmra.mrb[12].mxu1 %vm259_vm3, %v613_v0 }
 0x713   :  { %1941 = vmatprep.mubr.msk.bf16.mxu1 %vm161_vm2, %v708_v62  ;;  %1940 = vmatpush3.bf16.msra.mxu1 %v718_v14 }
 0x714   :  { %1957 = vmatprep.subr.bf16.mxu1 %v2184_v43 }
 0x715   :  { %v817_v1 = vpop.f32.mrb[24].mxu0 }
 0x716   :  { %v1949_v2 = vpop.f32.mrb[25].mxu0  ;;  %v875_v3 = vsel %vm259_vm3, %v817_v1, -inf }
 0x717   :  { %876 = vmax.xlane.f32.xlu0 %v875_v3  ;;  %v820_v4 = vpop.f32.mrb[26].mxu0  ;;  %v1017_v3 = vld [vmem:[%s2517_s2 + $0x8] sm:$0xf] }
 0x718   :  { %v1950_v5 = vpop.f32.mrb[27].mxu0  ;;  %v878_v6 = vsel %vm259_vm3, %v820_v4, -inf }
 0x71b   :  { %879 = vmax.xlane.f32.xlu0 %v878_v6 }
 0x71d   :  { %v868_v7 = vpop.f32.mrb[28].mxu0 }
 0x71e   :  { %v1955_v8 = vpop.f32.mrb[29].mxu0  ;;  %v881_v9 = vsel %vm259_vm3, %v868_v7, -inf }
 0x71f   :  { %882 = vmax.xlane.f32.xlu0 %v881_v9  ;;  %v871_v10 = vpop.f32.mrb[30].mxu0 }
 0x720   :  { %v1956_v11 = vpop.f32.mrb[31].mxu0  ;;  %v884_v12 = vsel %vm259_vm3, %v871_v10, -inf }
 0x723   :  { %885 = vmax.xlane.f32.xlu0 %v884_v12 }
 0x7a4   :  { %v877_v15 = vpop.xlane.xlu0 %876 }
 0x7a5   :  { %v887_v16 = vsub.f32 %v817_v1, %v877_v15 }
 0x7a7   :  { %v891_v17 = vmul.f32 1.442695, %v887_v16 }
 0x7a8   :  { %v880_v18 = vpop.xlane.xlu0 %879 }
 0x7a9   :  { %2128 = vpow2.f32 %v891_v17  ;;  %v888_v19 = vsub.f32 %v820_v4, %v880_v18  ;;  %v1025_v4 = vsel %vm409_vm4, %v1017_v3, 0 }
 0x7ab   :  { %v893_v20 = vmul.f32 1.442695, %v888_v19 }
 0x7ac   :  { %v883_v21 = vpop.xlane.xlu0 %882 }
 0x7ad   :  { %2130 = vpow2.f32 %v893_v20  ;;  %v889_v22 = vsub.f32 %v868_v7, %v883_v21 }
 0x7af   :  { %v895_v23 = vmul.f32 1.442695, %v889_v22 }
 0x7b0   :  { %v886_v24 = vpop.xlane.xlu0 %885 }
 0x7b1   :  { %2132 = vpow2.f32 %v895_v23  ;;  %v890_v25 = vsub.f32 %v871_v10, %v886_v24 }
 0x7b3   :  { %v2129_v26 = vpop.eup %2128  ;;  %v897_v27 = vmul.f32 1.442695, %v890_v25 }
 0x7b4   :  { %v899_v28 = vsel %vm259_vm3, %v2129_v26, 0.0 }
 0x7b5   :  { %2134 = vpow2.f32 %v897_v27  ;;  %900 = vadd.xlane.f32.xlu1 %v899_v28 }
 0x7b7   :  { %v2131_v29 = vpop.eup %2130 }
 0x7b8   :  { %v902_v30 = vsel %vm259_vm3, %v2131_v29, 0.0 }
 0x7b9   :  { %903 = vadd.xlane.f32.xlu0 %v902_v30 }
 0x7bb   :  { %v2133_v31 = vpop.eup %2132 }
 0x7bc   :  { %v905_v32 = vsel %vm259_vm3, %v2133_v31, 0.0 }
 0x7bd   :  { %906 = vadd.xlane.f32.xlu0 %v905_v32 }
 0x7bf   :  { %v2135_v33 = vpop.eup %2134 }
 0x7c0   :  { %v908_v34 = vsel %vm259_vm3, %v2135_v33, 0.0 }
 0x7c1   :  { %909 = vadd.xlane.f32.xlu0 %v908_v34 }
 0x7c6   :  { %968 = vrot.lane.b32.xlu1 %v2281_v47, %s2193_s23 }
 0x7d7   :  { %921 = vrot.lane.b32.xlu0 %v2283_v49, %s2193_s23 }
 0x7db   :  { %1082 = vrot.lane.b32.xlu0 %v2283_v49, %s2194_s24 }
 0x7df   :  { %1133 = vrot.lane.b32.xlu0 %v2281_v47, %s2194_s24 }
 0x7e3   :  { %1080 = vrot.lane.b32.xlu0 %v2283_v49, %s2195_s25 }
 0x7e5   :  { %v701_v35 = vpop.f32.mrb[12].mxu1 }
 0x7e6   :  { %v1937_v36 = vpop.f32.mrb[13].mxu1 }
 0x7e7   :  { %v704_v41 = vpop.f32.mrb[14].mxu1  ;;  %1131 = vrot.lane.b32.xlu0 %v2281_v47, %s2195_s25 }
 0x7e8   :  { %v709_v42 = vpack.c.bf16 %v704_v41, %v701_v35  ;;  %v1938_v44 = vpop.f32.mrb[15].mxu1 }
 0x7ea   :  { %1942 = vmatmul.mubr.msk.bf16.vlgmr.msra.gmra.mrb[4].mxu1 %vm161_vm2, %v709_v42 }
 0x7eb   :  { %1959 = vmatprep.mubr.msk.bf16.mxu1 %vm2185_vm1, %v2184_v43 }
 0x842   :  { %v901_v45 = vpop.xlane.xlu1 %900 }
 0x843   :  { %2136 = vrcp.f32 %v901_v45 }
 0x846   :  { %v969_v46 = vpop.permute.xlu1 %968  ;;  %v904_v48 = vpop.xlane.xlu0 %903 }
 0x847   :  { %2138 = vrcp.f32 %v904_v48  ;;  %1964 = vmatpush3.bf16.msra.mxu0 %v969_v46 }
 0x848   :  { %1975 = vmatprep.subr.bf16.mxu0 %v2184_v43 }
 0x84a   :  { %v907_v50 = vpop.xlane.xlu0 %906 }
 0x84b   :  { %2140 = vrcp.f32 %v907_v50 }
 0x84d   :  { %v2137_v52 = vpop.eup %2136 }
 0x84e   :  { %v910_v51 = vpop.xlane.xlu0 %909  ;;  %v915_v54 = vmul.f32 %v2137_v52, %v2129_v26 }
 0x84f   :  { %2142 = vrcp.f32 %v910_v51 }
 0x851   :  { %v2139_v53 = vpop.eup %2138 }
 0x852   :  { %v916_v55 = vmul.f32 %v2139_v53, %v2131_v29  ;;  %v922_v56 = vpop.permute.xlu0 %921 }
 0x853   :  { %1958 = vmatpush3.bf16.msra.mxu1 %v922_v56 }
 0x854   :  { %v919_v57 = vpack.c.bf16 %v916_v55, %v915_v54  ;;  %2059 = vmatprep.subr.msk.bf16.mxu1 %vm409_vm4, %v1017_v3 }
 0x855   :  { %v2141_v58 = vpop.eup %2140 }
 0x856   :  { %1960 = vmatmul.mubr.msk.bf16.vlgmr.msra.gmra.mrb[16].mxu1 %vm259_vm3, %v919_v57  ;;  %v1083_v60 = vpop.permute.xlu0 %1082  ;;  %v917_v61 = vmul.f32 %v2141_v58, %v2133_v31 }
 0x857   :  { %v1088_v0 = vsel %vm161_vm2, %v1083_v60, 0  ;;  %1970 = vmatpush3.bf16.msra.mxu1 %v1025_v4 }
 0x858   :  { %1981 = vmatprep.subr.bf16.mxu1 %v2184_v43 }
 0x859   :  { %v2143_v59 = vpop.eup %2142 }
 0x85a   :  { %v918_v62 = vmul.f32 %v2143_v59, %v2135_v33  ;;  %v1134_v1 = vpop.permute.xlu0 %1133 }
 0x85b   :  { %v1139_v15 = vsel %vm161_vm2, %v1134_v1, 0 }
 0x85c   :  { %v920_v63 = vpack.c.bf16 %v918_v62, %v917_v61 }
 0x85e   :  { %1966 = vmatmul.mubr.msk.bf16.vlgmr.msra.gmra.mrb[32].mxu0 %vm259_vm3, %v920_v63  ;;  %v1081_v2 = vpop.permute.xlu0 %1080 }
 0x85f   :  { %1976 = vmatpush3.bf16.xpose.msra.mxu0 %v1088_v0  ;;  %1977 = vmatprep.mubr.msk.bf16.mxu0 %vm2185_vm1, %v2184_v43 }
 0x860   :  { %1987 = vmatprep.subr.bf16.mxu0 %v2184_v43 }
 0x862   :  { %v1132_v22 = vpop.permute.xlu0 %1131 }
 0x866   :  { %1978 = vmatmul.mubr.msk.bf16.vlgmr.msra.gmra.mrb[36].mxu0 %vm161_vm2, %v1081_v2 }
 0x867   :  { %1989 = vmatprep.mubr.msk.bf16.mxu0 %vm2185_vm1, %v2184_v43 }
 0x929   :  { %v961_v5 = vpop.f32.mrb[16].mxu1 }
 0x92a   :  { %v1961_v6 = vpop.f32.mrb[17].mxu1 }
 0x92b   :  { %v964_v7 = vpop.f32.mrb[18].mxu1 }
 0x92c   :  { %v1015_v8 = vpack.c.bf16 %v964_v7, %v961_v5  ;;  %v1962_v9 = vpop.f32.mrb[19].mxu1  ;;  %v1324_v5 = vld [vmem:[%s2517_s2 + $0xc] sm:$0xf] }
 0x92d   :  { %v1332_v6 = vsel %vm409_vm4, %v1324_v5, 0 }
 0x92e   :  { %1971 = vmatprep.mubr.msk.bf16.mxu1 %vm161_vm2, %v1015_v8 }
 0x931   :  { %v1008_v10 = vpop.f32.mrb[32].mxu0 }
 0x932   :  { %v1967_v11 = vpop.f32.mrb[33].mxu0 }
 0x933   :  { %v1011_v12 = vpop.f32.mrb[34].mxu0 }
 0x934   :  { %v1016_v13 = vpack.c.bf16 %v1011_v12, %v1008_v10  ;;  %v1968_v14 = vpop.f32.mrb[35].mxu0 }
 0x936   :  { %1972 = vmatmul.mubr.msk.bf16.vlgmr.msra.gmra.mrb[4].mxu1 %vm161_vm2, %v1016_v13 }
 0x937   :  { %1982 = vmatpush3.bf16.xpose.msra.mxu1 %v1139_v15  ;;  %1983 = vmatprep.mubr.msk.bf16.mxu1 %vm2185_vm1, %v2184_v43 }
 0x938   :  { %1993 = vmatprep.subr.bf16.mxu1 %v2184_v43 }
 0x939   :  { %v1124_v16 = vpop.f32.mrb[36].mxu0 }
 0x93a   :  { %v1979_v17 = vpop.f32.mrb[37].mxu0  ;;  %v1182_v18 = vsel %vm259_vm3, %v1124_v16, -inf }
 0x93b   :  { %1183 = vmax.xlane.f32.xlu0 %v1182_v18  ;;  %v1127_v19 = vpop.f32.mrb[38].mxu0 }
 0x93c   :  { %v1980_v20 = vpop.f32.mrb[39].mxu0  ;;  %v1185_v21 = vsel %vm259_vm3, %v1127_v19, -inf }
 0x93d   :  { %1186 = vmax.xlane.f32.xlu1 %v1185_v21 }
 0x93e   :  { %1984 = vmatmul.mubr.msk.bf16.vlgmr.msra.gmra.mrb[20].mxu1 %vm161_vm2, %v1132_v22 }
 0x93f   :  { %1995 = vmatprep.mubr.msk.bf16.mxu1 %vm2185_vm1, %v2184_v43 }
 0x9c8   :  { %v1184_v23 = vpop.xlane.xlu0 %1183 }
 0x9c9   :  { %v1194_v24 = vsub.f32 %v1124_v16, %v1184_v23 }
 0x9ca   :  { %v1187_v28 = vpop.xlane.xlu1 %1186 }
 0x9cb   :  { %v1198_v25 = vmul.f32 1.442695, %v1194_v24  ;;  %v1195_v29 = vsub.f32 %v1127_v19, %v1187_v28 }
 0x9cd   :  { %2144 = vpow2.f32 %v1198_v25  ;;  %v1200_v30 = vmul.f32 1.442695, %v1195_v29 }
 0x9cf   :  { %2146 = vpow2.f32 %v1200_v30 }
 0x9d7   :  { %v2145_v26 = vpop.eup %2144 }
 0x9d8   :  { %v1206_v27 = vsel %vm259_vm3, %v2145_v26, 0.0 }
 0x9d9   :  { %1207 = vadd.xlane.f32.xlu1 %v1206_v27  ;;  %v2147_v36 = vpop.eup %2146 }
 0x9da   :  { %v1209_v41 = vsel %vm259_vm3, %v2147_v36, 0.0 }
 0xa11   :  { %v1175_v31 = vpop.f32.mrb[20].mxu1 }
 0xa12   :  { %v1985_v32 = vpop.f32.mrb[21].mxu1  ;;  %v1188_v33 = vsel %vm259_vm3, %v1175_v31, -inf }
 0xa13   :  { %v1178_v34 = vpop.f32.mrb[22].mxu1  ;;  %1189 = vmax.xlane.f32.xlu0 %v1188_v33 }
 0xa14   :  { %v1986_v35 = vpop.f32.mrb[23].mxu1  ;;  %v1191_v43 = vsel %vm259_vm3, %v1178_v34, -inf }
 0xa17   :  { %1192 = vmax.xlane.f32.xlu0 %v1191_v43 }
 0xa1b   :  { %1210 = vadd.xlane.f32.xlu0 %v1209_v41 }
 0xa66   :  { %v1208_v56 = vpop.xlane.xlu1 %1207 }
 0xaa0   :  { %v1190_v42 = vpop.xlane.xlu0 %1189 }
 0xaa1   :  { %v1196_v44 = vsub.f32 %v1175_v31, %v1190_v42  ;;  %v2078_v31 = vld [vmem:[%s2519_s4] sm:$0xff]  }
 0xaa3   :  { %v1202_v45 = vmul.f32 1.442695, %v1196_v44 }
 0xaa4   :  { %v1193_v46 = vpop.xlane.xlu0 %1192 }
 0xaa5   :  { %2148 = vpow2.f32 %v1202_v45  ;;  %v1197_v48 = vsub.f32 %v1178_v34, %v1193_v46 }
 0xaa7   :  { %v1204_v50 = vmul.f32 1.442695, %v1197_v48 }
 0xaa8   :  { %v1211_v55 = vpop.xlane.xlu0 %1210 }
 0xaa9   :  { %2150 = vpow2.f32 %v1204_v50 }
 0xaaa   :  { %2152 = vrcp.f32 %v1211_v55 }
 0xaab   :  { %2154 = vrcp.f32 %v1208_v56 }
 0xaaf   :  { %v2149_v51 = vpop.eup %2148 }
 0xab0   :  { %v1212_v52 = vsel %vm259_vm3, %v2149_v51, 0.0 }
 0xab1   :  { %1213 = vadd.xlane.f32.xlu1 %v1212_v52 }
 0xab3   :  { %v2151_v53 = vpop.eup %2150 }
 0xab4   :  { %v1215_v54 = vsel %vm259_vm3, %v2151_v53, 0.0  ;;  %v2153_v57 = vpop.eup %2152 }
 0xab5   :  { %1216 = vadd.xlane.f32.xlu0 %v1215_v54  ;;  %v2155_v59 = vpop.eup %2154  ;;  %v1223_v60 = vmul.f32 %v2153_v57, %v2147_v36 }
 0xab6   :  { %v1222_v61 = vmul.f32 %v2155_v59, %v2145_v26 }
 0xab8   :  { %v1226_v0 = vpack.c.bf16 %v1223_v60, %v1222_v61 }
 0xac2   :  { %1228 = vrot.lane.b32.xlu1 %v2283_v49, %s2196_s28 }
 0xacb   :  { %1275 = vrot.lane.b32.xlu0 %v2281_v47, %s2196_s28 }
 0xb3e   :  { %v1214_v58 = vpop.xlane.xlu1 %1213 }
 0xb3f   :  { %2156 = vrcp.f32 %v1214_v58 }
 0xb42   :  { %v1217_v62 = vpop.xlane.xlu0 %1216  ;;  %v1229_v63 = vpop.permute.xlu1 %1228 }
 0xb43   :  { %2158 = vrcp.f32 %v1217_v62  ;;  %1988 = vmatpush3.bf16.msra.mxu0 %v1229_v63 }
 0xb46   :  { %v1276_v1 = vpop.permute.xlu0 %1275  ;;  %1990 = vmatmul.mubr.msk.bf16.vlgmr.msra.gmra.mrb[40].mxu0 %vm259_vm3, %v1226_v0 }
 0xb47   :  { %1994 = vmatpush3.bf16.msra.mxu1 %v1276_v1  ;;  %v2079_v1 = vld [vmem:[%s2519_s4 + $0x8] sm:$0xff]  }
 0xb48   :  { %2060 = vmatprep.subr.msk.bf16.mxu1 %vm409_vm4, %v1324_v5  ;;  %v2085_v5 = vld [vmem:[%s2521_s5 + $0x28] sm:$0xff]  }
 0xb49   :  { %v2157_v47 = vpop.eup %2156 }
 0xb4a   :  { %v1224_v2 = vmul.f32 %v2157_v47, %v2149_v51  ;;  %v2080_v47 = vld [vmem:[%s2521_s5] sm:$0xff]  }
 0xb4d   :  { %v2159_v49 = vpop.eup %2158 }
 0xb4e   :  { %v1225_v3 = vmul.f32 %v2159_v49, %v2151_v53  ;;  %v1773_v53 = vld [vmem:[%s2520_s7] ss:$0 sm:$0xff]  ;;  %v2081_v49 = vld [vmem:[%s2521_s5 + $0x8] sm:$0xff]  }
 0xb50   :  { %v1227_v4 = vpack.c.bf16 %v1225_v3, %v1224_v2  ;;  %v2082_v2 = vld [vmem:[%s2521_s5 + $0x10] sm:$0xff]   ;;  %v2083_v3 = vld [vmem:[%s2521_s5 + $0x18] sm:$0xff]  }
 0xb52   :  { %1996 = vmatmul.mubr.msk.bf16.vlgmr.msra.gmra.mrb[24].mxu1 %vm259_vm3, %v1227_v4  ;;  %v2084_v4 = vld [vmem:[%s2521_s5 + $0x20] sm:$0xff]  }
 0xb53   :  { %2000 = vmatpush3.bf16.msra.mxu1 %v1332_v6  ;;  %v2086_v6 = vld [vmem:[%s2521_s5 + $0x30] sm:$0xff]  }
 0xb54   :  { %2021 = vmatprep.subr.bf16.mxu1 %v2080_v47 }
 0xc19   :  { %v1268_v7 = vpop.f32.mrb[40].mxu0 }
 0xc1a   :  { %v1991_v8 = vpop.f32.mrb[41].mxu0 }
 0xc1b   :  { %v1271_v9 = vpop.f32.mrb[42].mxu0 }
 0xc1c   :  { %v1322_v10 = vpack.c.bf16 %v1271_v9, %v1268_v7  ;;  %v1992_v11 = vpop.f32.mrb[43].mxu0  ;;  %v2087_v7 = vld [vmem:[%s2521_s5 + $0x38] sm:$0xff]  }
 0xc1e   :  { %2001 = vmatprep.mubr.msk.bf16.mxu1 %vm161_vm2, %v1322_v10 }
 0xc25   :  { %v1315_v12 = vpop.f32.mrb[24].mxu1 }
 0xc26   :  { %v1997_v13 = vpop.f32.mrb[25].mxu1 }
 0xc27   :  { %v1318_v14 = vpop.f32.mrb[26].mxu1 }
 0xc28   :  { %v1323_v15 = vpack.c.bf16 %v1318_v14, %v1315_v12  ;;  %v1998_v16 = vpop.f32.mrb[27].mxu1 }
 0xc2a   :  { %2002 = vmatmul.mubr.msk.bf16.vlgmr.msra.gmra.mrb[4].mxu1 %vm161_vm2, %v1323_v15 }
 0xc2b   :  { %2022 = vmatpush3.bf16.msra.mxu1 %v2080_v47 }
 0xc2c   :  { %2023 = vmatprep.subr.bf16.mxu1 %v2081_v49 }
 0xc2f   :  { %2024 = vmatpush3.bf16.msra.mxu1 %v2081_v49 }
 0xc30   :  { %2025 = vmatprep.subr.bf16.mxu1 %v2082_v2 }
 0xc33   :  { %2026 = vmatpush3.bf16.msra.mxu1 %v2082_v2 }
 0xc34   :  { %2027 = vmatprep.subr.bf16.mxu1 %v2083_v3 }
 0xc37   :  { %2028 = vmatpush3.bf16.msra.mxu1 %v2083_v3 }
 0xc38   :  { %2029 = vmatprep.subr.bf16.mxu1 %v2084_v4 }
 0xc3b   :  { %2030 = vmatpush3.bf16.msra.mxu1 %v2084_v4 }
 0xc3c   :  { %2031 = vmatprep.subr.bf16.mxu1 %v2085_v5 }
 0xc3f   :  { %2032 = vmatpush3.bf16.msra.mxu1 %v2085_v5 }
 0xc40   :  { %2033 = vmatprep.subr.bf16.mxu1 %v2086_v6 }
 0xc43   :  { %2034 = vmatpush3.bf16.msra.mxu1 %v2086_v6 }
 0xc44   :  { %2035 = vmatprep.subr.bf16.mxu1 %v2087_v7 }
 0xc47   :  { %2036 = vmatpush3.bf16.msra.mxu1 %v2087_v7 }
 0xcfd   :  { %v2003_v17 = vpop.f32.mrb[4].mxu1 }
 0xcfe   :  { %v1368_v18 = vpop.f32.mrb[5].mxu1  ;;  %v2041_v19 = vadd.f32 %v2003_v17, %v2261_v37 }
 0xcff   :  { %v2042_v20 = vadd.f32 %v1368_v18, %v2265_v39  ;;  %v2004_v21 = vpop.f32.mrb[6].mxu1 }
 0xd00   :  { %v1371_v22 = vpop.f32.mrb[7].mxu1  ;;  %v2043_v23 = vadd.f32 %v2004_v21, %v2263_v38  ;;  %v1390_v28 = vmul.f32 %v2041_v19, %v2041_v19  ;;  %v2076_v38 = vld [vmem:[%s2518_s3] sm:$0xff]  }
 0xd01   :  { %v2044_v24 = vadd.f32 %v1371_v22, %v2267_v40  ;;  %v1388_v25 = vmul.f32 %v2042_v20, %v2042_v20  ;;  %2005 = vmatprep.subr.bf16.mxu0 %v2076_v38  ;;  %v2077_v40 = vld [vmem:[%s2518_s3 + $0x8] sm:$0xff]  }
 0xd02   :  { %v1391_v30 = vmul.f32 %v2043_v23, %v2043_v23  ;;  %v1398_v37 = vsel %vm43_vm0, %v1390_v28, 0.0  ;;  %2006 = vmatpush3.bf16.msra.mxu0 %v2076_v38 }
 0xd03   :  { %v1392_v26 = vsel %vm43_vm0, %v1388_v25, 0.0  ;;  %v1389_v27 = vmul.f32 %v2044_v24, %v2044_v24  ;;  %2007 = vmatprep.subr.bf16.mxu0 %v2077_v40 }
 0xd04   :  { %1393 = vadd.xlane.f32.xlu1 %v1392_v26  ;;  %v1401_v39 = vsel %vm43_vm0, %v1391_v30, 0.0 }
 0xd05   :  { %v1395_v29 = vsel %vm43_vm0, %v1389_v27, 0.0 }
 0xd06   :  { %1396 = vadd.xlane.f32.xlu0 %v1395_v29  ;;  %2008 = vmatpush3.bf16.msra.mxu0 %v2077_v40 }
 0xd07   :  { %2013 = vmatprep.subr.bf16.mxu0 %v2078_v31 }
 0xd08   :  { %1399 = vadd.xlane.f32.xlu1 %v1398_v37 }
 0xd0a   :  { %1402 = vadd.xlane.f32.xlu0 %v1401_v39 }
 0xd91   :  { %v1394_v32 = vpop.xlane.xlu1 %1393 }
 0xd92   :  { %v1404_v33 = vmul.f32 0.03125, %v1394_v32 }
 0xd93   :  { %v1397_v34 = vpop.xlane.xlu0 %1396 }
 0xd94   :  { %v1408_v35 = vadd.f32 1e-06, %v1404_v33  ;;  %v1405_v43 = vmul.f32 0.03125, %v1397_v34 }
 0xd95   :  { %v1400_v36 = vpop.xlane.xlu1 %1399 }
 0xd96   :  { %2160 = vrsqrt.f32 %v1408_v35  ;;  %v1409_v41 = vadd.f32 1e-06, %v1405_v43  ;;  %v1406_v42 = vmul.f32 0.03125, %v1400_v36 }
 0xd97   :  { %v1403_v44 = vpop.xlane.xlu0 %1402 }
 0xd98   :  { %2162 = vrsqrt.f32 %v1409_v41  ;;  %v1410_v45 = vadd.f32 1e-06, %v1406_v42  ;;  %v1407_v46 = vmul.f32 0.03125, %v1403_v44 }
 0xd9a   :  { %2164 = vrsqrt.f32 %v1410_v45  ;;  %v1411_v48 = vadd.f32 1e-06, %v1407_v46 }
 0xd9c   :  { %2166 = vrsqrt.f32 %v1411_v48 }
 0xda0   :  { %v2161_v50 = vpop.eup %2160 }
 0xda1   :  { %v1416_v51 = vmul.f32 %v2161_v50, %v2042_v20 }
 0xda2   :  { %v2163_v52 = vpop.eup %2162 }
 0xda3   :  { %v1417_v54 = vmul.f32 %v2163_v52, %v2044_v24  ;;  %v2455_v57 = vmul.f32 %v1773_v53, %v1416_v51 }
 0xda4   :  { %v2165_v55 = vpop.eup %2164 }
 0xda5   :  { %v1418_v56 = vmul.f32 %v2165_v55, %v2041_v19  ;;  %v2457_v58 = vmul.f32 %v1773_v53, %v1417_v54 }
 0xda6   :  { %v2167_v59 = vpop.eup %2166 }
 0xda7   :  { %v1419_v60 = vmul.f32 %v2167_v59, %v2043_v23  ;;  %v1430_v61 = vpack.c.bf16 %v2457_v58, %v2455_v57  ;;  %v2462_v62 = vmul.f32 %v1773_v53, %v1418_v56 }
 0xda9   :  { %2009 = vmatprep.mubr.msk.bf16.mxu0 %vm43_vm0, %v1430_v61  ;;  %v2464_v63 = vmul.f32 %v1773_v53, %v1419_v60 }
 0xdab   :  { %v1431_v0 = vpack.c.bf16 %v2464_v63, %v2462_v62 }
 0xdad   :  { %2010 = vmatmul.mubr.msk.bf16.vlgmr.msra.gmra.mrb[44].mxu0 %vm43_vm0, %v1431_v0 }
 0xdae   :  { %2014 = vmatpush3.bf16.msra.mxu0 %v2078_v31  ;;  %2017 = vmatprep.mubr.msk.bf16.mxu0 %vm43_vm0, %v1430_v61 }
 0xdaf   :  { %2015 = vmatprep.subr.bf16.mxu0 %v2079_v1 }
 0xdb2   :  { %2016 = vmatpush3.bf16.msra.mxu0 %v2079_v1 }
 0xdb5   :  { %2018 = vmatmul.mubr.msk.bf16.vlgmr.msra.gmra.mrb[48].mxu0 %vm43_vm0, %v1431_v0 }
 0xe80   :  { %v2011_v8 = vpop.f32.mrb[44].mxu0 }
 0xe81   :  { %v1488_v9 = vpop.f32.mrb[45].mxu0 }
 0xe82   :  { %v2012_v10 = vpop.f32.mrb[46].mxu0 }
 0xe83   :  { %v1491_v11 = vpop.f32.mrb[47].mxu0 }
 0xe88   :  { %v2019_v12 = vpop.f32.mrb[48].mxu0 }
 0xe89   :  { %v1784_v13 = vmul.f32 -1.442695, %v2019_v12  ;;  %v1553_v14 = vpop.f32.mrb[49].mxu0 }
 0xe8a   :  { %v1782_v15 = vmul.f32 -1.442695, %v1553_v14  ;;  %v2020_v16 = vpop.f32.mrb[50].mxu0 }
 0xe8b   :  { %2168 = vpow2.f32 %v1784_v13  ;;  %v1785_v17 = vmul.f32 -1.442695, %v2020_v16  ;;  %v1556_v18 = vpop.f32.mrb[51].mxu0 }
 0xe8c   :  { %2170 = vpow2.f32 %v1782_v15  ;;  %v1783_v19 = vmul.f32 -1.442695, %v1556_v18 }
 0xe8d   :  { %2172 = vpow2.f32 %v1785_v17 }
 0xe8e   :  { %2174 = vpow2.f32 %v1783_v19 }
 0xe95   :  { %v2169_v20 = vpop.eup %2168 }
 0xe96   :  { %v2171_v21 = vpop.eup %2170  ;;  %v1582_v22 = vadd.f32 1.0, %v2169_v20 }
 0xe97   :  { %v2173_v23 = vpop.eup %2172  ;;  %v1580_v24 = vadd.f32 1.0, %v2171_v21 }
 0xe98   :  { %v2175_v25 = vpop.eup %2174  ;;  %2176 = vrcp.f32 %v1582_v22  ;;  %v1583_v26 = vadd.f32 1.0, %v2173_v23 }
 0xe99   :  { %2178 = vrcp.f32 %v1580_v24  ;;  %v1581_v27 = vadd.f32 1.0, %v2175_v25 }
 0xe9a   :  { %2180 = vrcp.f32 %v1583_v26 }
 0xe9b   :  { %2182 = vrcp.f32 %v1581_v27 }
 0xea2   :  { %v2177_v28 = vpop.eup %2176 }
 0xea3   :  { %v2179_v29 = vpop.eup %2178  ;;  %v1594_v30 = vmul.f32 %v2177_v28, %v2019_v12 }
 0xea4   :  { %v2181_v37 = vpop.eup %2180  ;;  %v1592_v39 = vmul.f32 %v2179_v29, %v1553_v14 }
 0xea5   :  { %v2183_v38 = vpop.eup %2182  ;;  %v1598_v40 = vmul.f32 %v2011_v8, %v1594_v30  ;;  %v1595_v31 = vmul.f32 %v2181_v37, %v2020_v16 }
 0xea6   :  { %v1596_v32 = vmul.f32 %v1592_v39, %v1488_v9  ;;  %v1593_v33 = vmul.f32 %v2183_v38, %v1556_v18 }
 0xea7   :  { %v1599_v34 = vmul.f32 %v2012_v10, %v1595_v31 }
 0xea8   :  { %v1597_v35 = vmul.f32 %v1593_v33, %v1491_v11 }
 0xea9   :  { %v1601_v43 = vpack.c.bf16 %v1599_v34, %v1598_v40 }
 0xeaa   :  { %v1600_v36 = vpack.c.bf16 %v1597_v35, %v1596_v32 }
 0xeac   :  { %2037 = vmatprep.mubr.bf16.mxu1 %v1600_v36 }
 0xead   :  { %2038 = vmatmul.mubr.bf16.vlgmr.msra.gmra.mrb[28].mxu1 %v1601_v43 }
 0xf80   :  { %v2039_v41 = vpop.f32.mrb[28].mxu1 }
 0xf81   :  { %v1717_v42 = vadd.f32 %v2039_v41, %v2462_v62  ;;  %v1700_v44 = vpop.f32.mrb[29].mxu1 }
 0xf82   :  { %v1715_v45 = vadd.f32 %v1700_v44, %v2455_v57  ;;  %v2040_v46 = vpop.f32.mrb[30].mxu1 }
 0xf83   :  { %v1800_v48 = vpack.c.bf16 %v1717_v42, %v1717_v42  ;;  %v1718_v50 = vadd.f32 %v2040_v46, %v2464_v63  ;;  %v1703_v51 = vpop.f32.mrb[31].mxu1 }
 0xf84   :  { %v1798_v52 = vpack.c.bf16 %v1715_v45, %v1715_v45  ;;  %v1716_v53 = vadd.f32 %v1703_v51, %v2457_v58 }
 0xf85   :  { %1738 = vst.msk [vmem:[%s2522_s8 + $0x8] sm:$0xf] %vm1735_vm5, %v1800_v48  ;;  %v1801_v54 = vpack.c.bf16 %v1718_v50, %v1718_v50 }
 0xf86   :  { %1736 = vst.msk [vmem:[%s2522_s8] sm:$0xf] %vm1735_vm5, %v1798_v52  ;;  %v1799_v55 = vpack.c.bf16 %v1716_v53, %v1716_v53 }
 0xf87   :  { %1739 = vst.msk [vmem:[%s2522_s8 + $0xc] sm:$0xf] %vm1735_vm5, %v1801_v54 }
 0xf88   :  { %1737 = vst.msk [vmem:[%s2522_s8 + $0x4] sm:$0xf] %vm1735_vm5, %v1799_v55 }

</bundles_post_ra>
